<compile_context>
chip_gen: v7x
topology: tpu7x:2x2x1
jax: 0.10.0
libtpu: 0.0.40
codegen_flags: <defaults>
</compile_context>

<pallas_src>
import functools

import jax
import jax.numpy as jnp
import numpy as np
from jax import lax
from jax.experimental import pallas as pl
from jax.experimental.pallas import tpu as pltpu

LANE = 128   # TPU lane width: padded channel / head width (lane-dense compute + stores)


def _round_up(x, m):
    return (x + m - 1) // m * m


def _gt_layer_kernel(rows_sub_ref, cols_sub_ref, rows_lane_ref, qk_ref, v_ref,
                     acc_ref, att_ref, *, dim, dim_head, scatter_dtype):
    """grid = (core split, edge tile).  Single pass per edge tile:

      q = onehot(rows) @ qTab                 (f32: feeds exp(att), keep exact)
      k = onehot(cols) @ kTab                 (f32)
      expAtt = exp(clip((q*k) @ sel_dh))      -> written lane-dense to att_ref
      v = onehot(cols) @ vTab                 (scatter_dtype, linear path)
      acc[:, 0:128]   += onehot(rows).T @ (expAtt_bcast * v)  \  one fused 256-wide
      acc[:, 128:256] += onehot(rows).T @ expAtt              /  scatter matmul
    """
    t = pl.program_id(1)
    e_tile = rows_sub_ref.shape[0]
    n_pad = qk_ref.shape[0]

    @pl.when(t == 0)
    def _init():                                  # fresh accumulator per core split
        acc_ref[...] = jnp.zeros_like(acc_ref)

    # One-hot gather / scatter matrices built in-register from the int32 indices.
    # Padded edges carry index -1 -> all-zero row -> contribute nothing anywhere.
    rows_sub = rows_sub_ref[...]                  # (e_tile, 1)  edges on sublanes
    cols_sub = cols_sub_ref[...]                  # (e_tile, 1)
    rows_lane = rows_lane_ref[...]                # (1, e_tile)  edges on lanes
    node_l = lax.broadcasted_iota(jnp.int32, (e_tile, n_pad), 1)
    node_s = lax.broadcasted_iota(jnp.int32, (n_pad, e_tile), 0)
    prow = (rows_sub == node_l).astype(jnp.float32)       # gather q at row nodes (f32)
    col_hit = cols_sub == node_l
    pcol = col_hit.astype(jnp.float32)                     # gather k at col nodes (f32)
    pcol_lp = col_hit.astype(scatter_dtype)                # gather v (linear path)
    prow_t = (rows_lane == node_s).astype(scatter_dtype)   # scatter-add to row nodes

    # Head selectors from iota (nothing shipped from HBM, no transposes, no division).
    d_r = lax.broadcasted_iota(jnp.int32, (LANE, LANE), 0)
    h_c = lax.broadcasted_iota(jnp.int32, (LANE, LANE), 1)
    sel_dh = ((d_r >= h_c * dim_head) & (d_r < (h_c + 1) * dim_head)
              & (d_r < dim)).astype(jnp.float32)            # channel d -> its head
    h_r = lax.broadcasted_iota(jnp.int32, (LANE, LANE), 0)
    d_c = lax.broadcasted_iota(jnp.int32, (LANE, LANE), 1)
    sel_hd = ((d_c >= h_r * dim_head) & (d_c < (h_r + 1) * dim_head)
              & (d_c < dim)).astype(scatter_dtype)           # head h -> its channels

    # q/k gathers + per-head dot stay f32: their error would be amplified by exp(att).
    q = jnp.dot(prow, qk_ref[:, 0:LANE], preferred_element_type=jnp.float32)
    k = jnp.dot(pcol, qk_ref[:, LANE:2 * LANE], preferred_element_type=jnp.float32)
    att = jnp.dot(q * k, sel_dh, preferred_element_type=jnp.float32)
    att = jnp.clip(att, -10.0, 10.0)
    exp_att = jnp.exp(att)
    # Un-normalized attention, lane-dense, written every step.  Padded edges / padded
    # head columns hold exp(0) = 1 and are sliced off in the wrapper - never consume
    # this output un-sliced.
    att_ref[...] = exp_att

    # v path + fused scatter in scatter_dtype (bf16 by default): values enter linearly.
    v = jnp.dot(pcol_lp, v_ref[...], preferred_element_type=jnp.float32)
    scale = jnp.dot(exp_att.astype(scatter_dtype), sel_hd,
                    preferred_element_type=jnp.float32)       # head weight -> channels
    payload = jnp.concatenate([(scale * v).astype(scatter_dtype),
                               exp_att.astype(scatter_dtype)], axis=1)   # (e_tile, 256)
    # One 256-wide scatter matmul updates res_unnorm and the softmax denominator
    # together (fills the full MXU width on v6e/v7x; harmless on v5e's 128-wide MXU).
    acc_ref[...] += jnp.dot(prow_t, payload, preferred_element_type=jnp.float32)


def gt_layer_pallas(rows, cols, embeds, wq, wk, wv, head, *,
                    e_tile=None, num_core_splits=2, scatter_dtype=jnp.bfloat16):
    """GTLayer.forward: rows/cols are the COO indices of the sparse adjacency."""
    N, D = embeds.shape
    E = int(rows.shape[0])
    H = int(head)
    Dh = D // H
    assert D % H == 0 and D <= LANE and H <= LANE

    # VMEM budget per generation: ~70% of the chip's physical capacity (headroom for
    # compiler scratch + double-buffered inputs) instead of a flat 64 MiB, which is the
    # ENTIRE per-core VMEM on v7x.  -> ~45 MiB on v7x, ~94 MiB on v5e/v6e.
    try:
        vmem_cap = int(pltpu.get_tpu_info().vmem_capacity_bytes)
    except Exception:
        vmem_cap = 64 * 1024 * 1024
    vmem_limit = max(32 * 1024 * 1024, min(int(vmem_cap * 0.7), 96 * 1024 * 1024))

    # Edge tile: multiple of 128 (lane-dense index stream + exp(att) stores).  Per-step
    # VMEM ~ 3 one-hot tiles (e_tile*N_pad*(4+2+2) B) + double-buffered att out
    # (2*e_tile*128*4 B) + residents (N_pad*(2*256*4 + 128*2) B); e_tile=1024 fits the
    # v5e/v6e budget comfortably at small N_pad, v7x (64 MiB) keeps 512.  Re-derive when
    # N_pad grows - the e_tile*N_pad one-hot tiles dominate.
    if e_tile is None:
        e_tile = 1024 if vmem_cap >= (96 << 20) else 512
    e_tile = min(_round_up(e_tile, LANE), _round_up(E, LANE))

    C = max(1, int(num_core_splits))      # v7x: one edge-list split per TensorCore
    n_tiles = -(-E // e_tile)
    tpc = -(-n_tiles // C)                # edge tiles per core split
    E_pad = C * tpc * e_tile
    N_pad = _round_up(N, LANE)            # lane-dense one-hot tiles / clean MXU K

    f32 = jnp.float32
    # ---- cheap O(E + N*D) XLA glue: padded indices + node-level q/k/v projection ----
    rows_i = jnp.full((E_pad,), -1, jnp.int32).at[:E].set(rows.astype(jnp.int32))
    cols_i = jnp.full((E_pad,), -1, jnp.int32).at[:E].set(cols.astype(jnp.int32))
    rows_sub = rows_i[:, None]            # (E_pad, 1): edges on sublanes (gathers)
    cols_sub = cols_i[:, None]
    rows_lane = rows_i[None, :]           # (1, E_pad): edges on lanes (scatter-adds)

    emb_p = jnp.zeros((N_pad, D), f32).at[:N].set(embeds.astype(f32))
    # Node-level projections done once in XLA (was an in-kernel init matmul + 2 inputs).
    qk_tab = (jnp.zeros((N_pad, 2 * LANE), f32)
              .at[:, 0:D].set(emb_p @ wq.astype(f32))
              .at[:, LANE:LANE + D].set(emb_p @ wk.astype(f32)))
    v_tab = (jnp.zeros((N_pad, LANE), f32)
             .at[:, 0:D].set(emb_p @ wv.astype(f32))).astype(scatter_dtype)

    grid = (C, tpc)                       # (core split, edge tile)

    acc_p, exp_att_p = pl.pallas_call(
        functools.partial(_gt_layer_kernel, dim=D, dim_head=Dh,
                          scatter_dtype=scatter_dtype),
        grid=grid,
        in_specs=[
            pl.BlockSpec((e_tile, 1), lambda c, t: (c * tpc + t, 0)),   # rows (sublane)
            pl.BlockSpec((e_tile, 1), lambda c, t: (c * tpc + t, 0)),   # cols (sublane)
            pl.BlockSpec((1, e_tile), lambda c, t: (0, c * tpc + t)),   # rows (lane)
            # Resident projected node tables (constant index map).
            # TODO(synk): pipeline_mode=pl.Buffered(1) here would drop their second
            #             buffer once N_pad*(256*4+128*2) bytes matter on v7x's 64 MiB.
            pl.BlockSpec((N_pad, 2 * LANE), lambda c, t: (0, 0)),       # [q | k]  f32
            pl.BlockSpec((N_pad, LANE), lambda c, t: (0, 0)),           # [v]      bf16
        ],
        out_specs=(
            # Per-core-split resident accumulator [res_unnorm | softmax denominator].
            pl.BlockSpec((N_pad, 2 * LANE), lambda c, t: (c, 0)),
            # exp(att), lane-dense, written every step (no pass-dependent index map).
            pl.BlockSpec((e_tile, LANE), lambda c, t: (c * tpc + t, 0)),
        ),
        out_shape=(
            jax.ShapeDtypeStruct((C * N_pad, 2 * LANE), jnp.float32),
            jax.ShapeDtypeStruct((E_pad, LANE), jnp.float32),
        ),
        compiler_params=pltpu.CompilerParams(
            # Core-split axis is parallel (independent accumulator blocks -> shardable
            # across v7x's two TensorCores); the edge-tile axis is a sequential
            # reduction into the resident accumulator.
            dimension_semantics=("parallel", "arbitrary"),
            vmem_limit_bytes=vmem_limit,
        ),
    )(rows_sub, cols_sub, rows_lane, qk_tab, v_tab)

    # ---- cheap O(N*D + E*H) XLA epilogue: combine core partials + factored divide ----
    acc = acc_p.reshape(C, N_pad, 2 * LANE).sum(axis=0)
    norm = acc[:N, LANE:LANE + H]                        # per-(node, head) denominator
    res = acc[:N, :D] / (jnp.repeat(norm, Dh, axis=1) + 1e-8)
    att = exp_att_p[:E, :H] / (norm[rows] + 1e-8)
    # TODO(synk): for N beyond a few thousand the O(E*N) one-hot gather/scatter must be
    #             replaced by scalar-prefetched per-edge row DMAs (PrefetchScalarGridSpec)
    #             or node-axis tiling; fine at these sizes.
    # TODO(synk): makeNoise (Gumbel noise) is defined on the module but unused in forward().
    return res, att


def gt_layer_ref(rows, cols, embeds, wq, wk, wv, head):
    # Pure-JAX reference mirroring the PyTorch forward.
    N, D = embeds.shape
    H = head
    Dh = D // H
    rowE = embeds[rows]
    colE = embeds[cols]
    q = (rowE @ wq).reshape(-1, H, Dh)
    k = (colE @ wk).reshape(-1, H, Dh)
    v = (colE @ wv).reshape(-1, H, Dh)
    att = jnp.einsum('ehd,ehd->eh', q, k)
    att = jnp.clip(att, -10.0, 10.0)
    expAtt = jnp.exp(att)
    attNorm = jnp.zeros((N, H), jnp.float32).at[rows].add(expAtt)[rows]
    att = expAtt / (attNorm + 1e-8)
    resEdge = jnp.einsum('eh,ehd->ehd', att, v).reshape(-1, D)
    res = jnp.zeros((N, D), jnp.float32).at[rows].add(resEdge)
    return res, att


if __name__ == "__main__":
    key = jax.random.PRNGKey(0)
    N, D, H, E = 50, 32, 4, 300     # nodes, dim_E, heads, nnz(adj)

    k_emb, k_q, k_k, k_v, k_r, k_c = jax.random.split(key, 6)
    bound = float(np.sqrt(6.0 / (D + D)))       # xavier_uniform for a (D, D) parameter
    wq = jax.random.uniform(k_q, (D, D), jnp.float32, -bound, bound)
    wk = jax.random.uniform(k_k, (D, D), jnp.float32, -bound, bound)
    wv = jax.random.uniform(k_v, (D, D), jnp.float32, -bound, bound)
    embeds = jax.random.normal(k_emb, (N, D), jnp.float32)

    # Synthetic sparse adjacency: E random (row, col) pairs; duplicates exercise the
    # scatter-add path.
    rows = jax.random.randint(k_r, (E,), 0, N)
    cols = jax.random.randint(k_c, (E,), 0, N)

    res_want, att_want = gt_layer_ref(rows, cols, embeds, wq, wk, wv, H)

    # Exercise: multi-tile exact-f32 scatter path (tight tolerance) and the default
    # single-tile bf16 scatter/v path (bf16 rounding of v / exp(att) is linear, ~4e-3).
    configs = [
        (128, jnp.float32, 2e-4),
        (None, jnp.bfloat16, 3e-2),
    ]
    for e_tile, sdt, tol in configs:
        res, att = gt_layer_pallas(rows, cols, embeds, wq, wk, wv, H,
                                   e_tile=e_tile, scatter_dtype=sdt)
        res, att = jax.block_until_ready((res, att))
        assert np.allclose(np.asarray(res), np.asarray(res_want),
                           rtol=tol, atol=tol), (e_tile, sdt)
        assert np.allclose(np.asarray(att), np.asarray(att_want),
                           rtol=tol, atol=tol), (e_tile, sdt)

    print("KERNEL_OK")
</pallas_src>

<mosaic_0001>
module attributes {stable_mosaic.version = 11 : i64} {
  func.func @_gt_layer_kernel(%arg0: i32, %arg1: i32, %arg2: memref<128x1xi32, #tpu.memory_space<vmem>>, %arg3: memref<128x1xi32, #tpu.memory_space<vmem>>, %arg4: memref<1x128xi32, #tpu.memory_space<vmem>>, %arg5: memref<128x256xf32, #tpu.memory_space<vmem>>, %arg6: memref<128x128xf32, #tpu.memory_space<vmem>>, %arg7: memref<128x256xf32, #tpu.memory_space<vmem>>, %arg8: memref<128x128xf32, #tpu.memory_space<vmem>>) attributes {dimension_semantics = [#tpu.dimension_semantics<parallel>, #tpu.dimension_semantics<arbitrary>], iteration_bounds = array<i64: 2, 2>, scalar_prefetch = 0 : i64, scratch_operands = 0 : i64, tpu.core_type = #tpu.core_type<tc>, window_params = [{transform_indices = @transform_0, window_bounds = array<i64: 128, 1>}, {transform_indices = @transform_1, window_bounds = array<i64: 128, 1>}, {transform_indices = @transform_2, window_bounds = array<i64: 1, 128>}, {pipeline_mode = #tpu.pipeline_mode<synchronous>, transform_indices = @transform_3, window_bounds = array<i64: 128, 256>}, {pipeline_mode = #tpu.pipeline_mode<synchronous>, transform_indices = @transform_4, window_bounds = array<i64: 128, 128>}, {transform_indices = @transform_5, window_bounds = array<i64: 128, 256>}, {transform_indices = @transform_6, window_bounds = array<i64: 128, 128>}]} {
    %c0_i32 = arith.constant 0 : i32
    %0 = arith.cmpi eq, %arg1, %c0_i32 : i32
    %1 = arith.extui %0 : i1 to i32
    %c0_i32_0 = arith.constant 0 : i32
    %2 = arith.cmpi ne, %1, %c0_i32_0 : i32
    scf.if %2 {
      %cst_29 = arith.constant 0.000000e+00 : f32
      %75 = vector.broadcast %cst_29 : f32 to vector<128x256xf32>
      %c0_30 = arith.constant 0 : index
      %c0_31 = arith.constant 0 : index
      %76 = vector.load %arg7[%c0_30, %c0_31] : memref<128x256xf32, #tpu.memory_space<vmem>>, vector<128x256xf32>
      tpu.vector_store %arg7[%c0_30, %c0_31], %75 {strides = array<i32>} : memref<128x256xf32, #tpu.memory_space<vmem>>, vector<128x256xf32>,
    } else {
    }
    %c0 = arith.constant 0 : index
    %c0_1 = arith.constant 0 : index
    %3 = vector.load %arg2[%c0, %c0_1] : memref<128x1xi32, #tpu.memory_space<vmem>>, vector<128x1xi32>
    %c0_2 = arith.constant 0 : index
    %c0_3 = arith.constant 0 : index
    %4 = vector.load %arg3[%c0_2, %c0_3] : memref<128x1xi32, #tpu.memory_space<vmem>>, vector<128x1xi32>
    %c0_4 = arith.constant 0 : index
    %c0_5 = arith.constant 0 : index
    %5 = vector.load %arg4[%c0_4, %c0_5] : memref<1x128xi32, #tpu.memory_space<vmem>>, vector<1x128xi32>
    %6 = tpu.iota {dimensions = array<i32: 1>} : vector<128x128xi32>
    %7 = tpu.iota {dimensions = array<i32: 0>} : vector<128x128xi32>
    %8 = vector.broadcast %3 : vector<128x1xi32> to vector<128x128xi32>
    %9 = arith.cmpi eq, %8, %6 : vector<128x128xi32>
    %10 = arith.extui %9 : vector<128x128xi1> to vector<128x128xi32>
    %11 = arith.sitofp %10 : vector<128x128xi32> to vector<128x128xf32>
    %12 = vector.broadcast %4 : vector<128x1xi32> to vector<128x128xi32>
    %13 = arith.cmpi eq, %12, %6 : vector<128x128xi32>
    %14 = arith.extui %13 : vector<128x128xi1> to vector<128x128xi32>
    %15 = arith.sitofp %14 : vector<128x128xi32> to vector<128x128xf32>
    %16 = arith.extui %13 : vector<128x128xi1> to vector<128x128xi32>
    %17 = arith.sitofp %16 : vector<128x128xi32> to vector<128x128xf32>
    %18 = vector.broadcast %5 : vector<1x128xi32> to vector<128x128xi32>
    %19 = arith.cmpi eq, %18, %7 : vector<128x128xi32>
    %20 = arith.extui %19 : vector<128x128xi1> to vector<128x128xi32>
    %21 = arith.sitofp %20 : vector<128x128xi32> to vector<128x128xf32>
    %22 = tpu.iota {dimensions = array<i32: 0>} : vector<128x128xi32>
    %23 = tpu.iota {dimensions = array<i32: 1>} : vector<128x128xi32>
    %c8_i32 = arith.constant 8 : i32
    %24 = vector.broadcast %c8_i32 : i32 to vector<128x128xi32>
    %25 = arith.muli %23, %24 : vector<128x128xi32>
    %26 = arith.cmpi sge, %22, %25 : vector<128x128xi32>
    %c1_i32 = arith.constant 1 : i32
    %27 = vector.broadcast %c1_i32 : i32 to vector<128x128xi32>
    %28 = arith.addi %23, %27 : vector<128x128xi32>
    %c8_i32_6 = arith.constant 8 : i32
    %29 = vector.broadcast %c8_i32_6 : i32 to vector<128x128xi32>
    %30 = arith.muli %28, %29 : vector<128x128xi32>
    %31 = arith.cmpi slt, %22, %30 : vector<128x128xi32>
    %32 = arith.andi %26, %31 : vector<128x128xi1>
    %c32_i32 = arith.constant 32 : i32
    %33 = vector.broadcast %c32_i32 : i32 to vector<128x128xi32>
    %34 = arith.cmpi slt, %22, %33 : vector<128x128xi32>
    %35 = arith.andi %32, %34 : vector<128x128xi1>
    %36 = arith.extui %35 : vector<128x128xi1> to vector<128x128xi32>
    %37 = arith.sitofp %36 : vector<128x128xi32> to vector<128x128xf32>
    %38 = tpu.iota {dimensions = array<i32: 0>} : vector<128x128xi32>
    %39 = tpu.iota {dimensions = array<i32: 1>} : vector<128x128xi32>
    %c8_i32_7 = arith.constant 8 : i32
    %40 = vector.broadcast %c8_i32_7 : i32 to vector<128x128xi32>
    %41 = arith.muli %38, %40 : vector<128x128xi32>
    %42 = arith.cmpi sge, %39, %41 : vector<128x128xi32>
    %c1_i32_8 = arith.constant 1 : i32
    %43 = vector.broadcast %c1_i32_8 : i32 to vector<128x128xi32>
    %44 = arith.addi %38, %43 : vector<128x128xi32>
    %c8_i32_9 = arith.constant 8 : i32
    %45 = vector.broadcast %c8_i32_9 : i32 to vector<128x128xi32>
    %46 = arith.muli %44, %45 : vector<128x128xi32>
    %47 = arith.cmpi slt, %39, %46 : vector<128x128xi32>
    %48 = arith.andi %42, %47 : vector<128x128xi1>
    %c32_i32_10 = arith.constant 32 : i32
    %49 = vector.broadcast %c32_i32_10 : i32 to vector<128x128xi32>
    %50 = arith.cmpi slt, %39, %49 : vector<128x128xi32>
    %51 = arith.andi %48, %50 : vector<128x128xi1>
    %52 = arith.extui %51 : vector<128x128xi1> to vector<128x128xi32>
    %53 = arith.sitofp %52 : vector<128x128xi32> to vector<128x128xf32>
    %c0_11 = arith.constant 0 : index
    %c0_12 = arith.constant 0 : index
    %54 = vector.load %arg5[%c0_11, %c0_12] : memref<128x256xf32, #tpu.memory_space<vmem>>, vector<128x128xf32>
    %cst = arith.constant dense<0.000000e+00> : vector<128x128xf32>
    %55 = tpu.matmul %11, %54, %cst {dimension_numbers = #tpu.dot_dimension_numbers<[1], [0], [0], [1], [0, 0, 1, 1], [], []>} : vector<128x128xf32>, vector<128x128xf32>, vector<128x128xf32> -> vector<128x128xf32>
    %c0_13 = arith.constant 0 : index
    %c128 = arith.constant 128 : index
    %56 = vector.load %arg5[%c0_13, %c128] : memref<128x256xf32, #tpu.memory_space<vmem>>, vector<128x128xf32>
    %cst_14 = arith.constant dense<0.000000e+00> : vector<128x128xf32>
    %57 = tpu.matmul %15, %56, %cst_14 {dimension_numbers = #tpu.dot_dimension_numbers<[1], [0], [0], [1], [0, 0, 1, 1], [], []>} : vector<128x128xf32>, vector<128x128xf32>, vector<128x128xf32> -> vector<128x128xf32>
    %58 = arith.mulf %55, %57 : vector<128x128xf32>
    %cst_15 = arith.constant dense<0.000000e+00> : vector<128x128xf32>
    %59 = tpu.matmul %58, %37, %cst_15 {dimension_numbers = #tpu.dot_dimension_numbers<[1], [0], [0], [1], [0, 0, 1, 1], [], []>} : vector<128x128xf32>, vector<128x128xf32>, vector<128x128xf32> -> vector<128x128xf32>
    %cst_16 = arith.constant -1.000000e+01 : f32
    %cst_17 = arith.constant 1.000000e+01 : f32
    %60 = vector.broadcast %cst_16 : f32 to vector<128x128xf32>
    %61 = arith.maximumf %60, %59 : vector<128x128xf32>
    %62 = vector.broadcast %cst_17 : f32 to vector<128x128xf32>
    %63 = arith.minimumf %62, %61 : vector<128x128xf32>
    %64 = math.exp %63 : vector<128x128xf32>
    %c0_18 = arith.constant 0 : index
    %c0_19 = arith.constant 0 : index
    %65 = vector.load %arg8[%c0_18, %c0_19] : memref<128x128xf32, #tpu.memory_space<vmem>>, vector<128x128xf32>
    tpu.vector_store %arg8[%c0_18, %c0_19], %64 {strides = array<i32>} : memref<128x128xf32, #tpu.memory_space<vmem>>, vector<128x128xf32>,
    %c0_20 = arith.constant 0 : index
    %c0_21 = arith.constant 0 : index
    %66 = vector.load %arg6[%c0_20, %c0_21] : memref<128x128xf32, #tpu.memory_space<vmem>>, vector<128x128xf32>
    %cst_22 = arith.constant dense<0.000000e+00> : vector<128x128xf32>
    %67 = tpu.matmul %17, %66, %cst_22 {dimension_numbers = #tpu.dot_dimension_numbers<[1], [0], [0], [1], [0, 0, 1, 1], [], []>} : vector<128x128xf32>, vector<128x128xf32>, vector<128x128xf32> -> vector<128x128xf32>
    %cst_23 = arith.constant dense<0.000000e+00> : vector<128x128xf32>
    %68 = tpu.matmul %64, %53, %cst_23 {dimension_numbers = #tpu.dot_dimension_numbers<[1], [0], [0], [1], [0, 0, 1, 1], [], []>} : vector<128x128xf32>, vector<128x128xf32>, vector<128x128xf32> -> vector<128x128xf32>
    %69 = arith.mulf %68, %67 : vector<128x128xf32>
    %70 = tpu.concatenate %69, %64 in 1 : vector<128x128xf32>, vector<128x128xf32> -> vector<128x256xf32>
    %c0_24 = arith.constant 0 : index
    %c0_25 = arith.constant 0 : index
    %71 = vector.load %arg7[%c0_24, %c0_25] : memref<128x256xf32, #tpu.memory_space<vmem>>, vector<128x256xf32>
    %cst_26 = arith.constant dense<0.000000e+00> : vector<128x256xf32>
    %72 = tpu.matmul %21, %70, %cst_26 {dimension_numbers = #tpu.dot_dimension_numbers<[1], [0], [0], [1], [0, 0, 1, 1], [], []>} : vector<128x128xf32>, vector<128x256xf32>, vector<128x256xf32> -> vector<128x256xf32>
    %73 = arith.addf %71, %72 : vector<128x256xf32>
    %c0_27 = arith.constant 0 : index
    %c0_28 = arith.constant 0 : index
    %74 = vector.load %arg7[%c0_27, %c0_28] : memref<128x256xf32, #tpu.memory_space<vmem>>, vector<128x256xf32>
    tpu.vector_store %arg7[%c0_27, %c0_28], %73 {strides = array<i32>} : memref<128x256xf32, #tpu.memory_space<vmem>>, vector<128x256xf32>,
    return
  }
  func.func @transform_0(%arg0: i32, %arg1: i32) -> (i32, i32) {
    %c2_i32 = arith.constant 2 : i32
    %0 = arith.muli %arg0, %c2_i32 : i32
    %1 = arith.addi %0, %arg1 : i32
    %c0_i32 = arith.constant 0 : i32
    %c0_i32_0 = arith.constant 0 : i32
    return %1, %c0_i32 : i32, i32
  }
  func.func @transform_1(%arg0: i32, %arg1: i32) -> (i32, i32) {
    %c2_i32 = arith.constant 2 : i32
    %0 = arith.muli %arg0, %c2_i32 : i32
    %1 = arith.addi %0, %arg1 : i32
    %c0_i32 = arith.constant 0 : i32
    %c0_i32_0 = arith.constant 0 : i32
    return %1, %c0_i32 : i32, i32
  }
  func.func @transform_2(%arg0: i32, %arg1: i32) -> (i32, i32) {
    %c2_i32 = arith.constant 2 : i32
    %0 = arith.muli %arg0, %c2_i32 : i32
    %1 = arith.addi %0, %arg1 : i32
    %c0_i32 = arith.constant 0 : i32
    %c0_i32_0 = arith.constant 0 : i32
    return %c0_i32, %1 : i32, i32
  }
  func.func @transform_3(%arg0: i32, %arg1: i32) -> (i32, i32) {
    %c0_i32 = arith.constant 0 : i32
    %c0_i32_0 = arith.constant 0 : i32
    %c0_i32_1 = arith.constant 0 : i32
    return %c0_i32, %c0_i32_0 : i32, i32
  }
  func.func @transform_4(%arg0: i32, %arg1: i32) -> (i32, i32) {
    %c0_i32 = arith.constant 0 : i32
    %c0_i32_0 = arith.constant 0 : i32
    %c0_i32_1 = arith.constant 0 : i32
    return %c0_i32, %c0_i32_0 : i32, i32
  }
  func.func @transform_5(%arg0: i32, %arg1: i32) -> (i32, i32) {
    %c0_i32 = arith.constant 0 : i32
    %c0_i32_0 = arith.constant 0 : i32
    return %arg0, %c0_i32 : i32, i32
  }
  func.func @transform_6(%arg0: i32, %arg1: i32) -> (i32, i32) {
    %c2_i32 = arith.constant 2 : i32
    %0 = arith.muli %arg0, %c2_i32 : i32
    %1 = arith.addi %0, %arg1 : i32
    %c0_i32 = arith.constant 0 : i32
    %c0_i32_0 = arith.constant 0 : i32
    return %1, %c0_i32 : i32, i32
  }
}

</mosaic_0001>

<bundles_post_ra>
// kernel: tpu_custom_call.1
= control target key start
LH: loop header
LB: loop body
LE: loop exit
PB: predicated region body
PF: predicated region fallthrough
CT: control target
= control target key end

     0   :  { %s4632_s0 = inlined_call_operand.vmem [shape: s32[512,1], index: 0, kind: input, shape index: {}]   ;;  %s4633_s1 = inlined_call_operand.vmem [shape: s32[512,1], index: 1, kind: input, shape index: {}]   ;;  %s4634_s2 = inlined_call_operand.vmem [shape: s32[1,512], index: 2, kind: input, shape index: {}]   ;;  %s4635_s3 = inlined_call_operand.vmem [shape: f32[128,256], index: 3, kind: input, shape index: {}]   ;;  %s4636_s4 = inlined_call_operand.vmem [shape: f32[128,128], index: 4, kind: input, shape index: {}]   ;;  %s4637_s5 = inlined_call_operand.hbm [shape: f32[256,256], index: 5, kind: output, shape index: {0}]   ;;  %s4638_s6 = inlined_call_operand.hbm [shape: f32[512,128], index: 6, kind: output, shape index: {1}]  }
   0x1   :  { %4654 = sst [smem:[#allocation18_spill]] %s4637_s5 }
   0x2   :  { %4655 = sst [smem:[#allocation19_spill]] %s4638_s6 }
   0x3   :  { %12 = vsyncpa [#allocation3], 0 }
   0x4   :  { %14 = vsyncpa [#allocation3 + $0x1], 0 }
   0x5   :  { %15 = vsyncpa [#allocation5], 0 }
   0x6   :  { %17 = vsyncpa [#allocation5 + $0x1], 0  ;;  %s3395_s21 = smov 0   ;;  %s3397_s22 = smov 0  }
   0x7   :  { %s3399_s23 = smov 0   ;;  %s3401_s24 = smov 0  }
   0x8   :  { %s3403_s25 = smov 0   ;;  %s3405_s26 = smov 0  }
   0x9   :  { %s3407_s27 = smov 0   ;;  %s3409_s28 = smov 0  }
   0xa   :  { %s3411_s29 = smov 0   ;;  %s3413_s30 = smov 0  }
   0xb   :  { %s3415_s7 = smov 0  }
   0xc LB: > { %4656 = sst [smem:[#allocation8_spill]] %s3315_s23  ;;  %s2261_s8 = sadd.s32 4294967295, %s3347_s7   ;;  %s3347_s7 = sphi %s3415_s7, %s23_s7   ;;  %s3343_s30 = sphi %s3413_s30, %s4745_s30   ;;  %s3339_s29 = sphi %s3411_s29, %s4744_s29   ;;  %s3335_s28 = sphi %s3409_s28, %s4743_s28   ;;  %s3331_s27 = sphi %s3407_s27, %s4742_s27   ;;  %s3327_s26 = sphi %s3405_s26, %s4741_s26   ;;  %s3323_s25 = sphi %s3403_s25, %s4749_s25   ;;  %s3319_s24 = sphi %s3401_s24, %s4748_s24   ;;  %s3315_s23 = sphi %s3399_s23, %s4739_s23   ;;  %s3311_s22 = sphi %s3397_s22, %s4747_s22   ;;  %s3307_s21 = sphi %s3395_s21, %s4746_s21  }
   0xd   : > { %4657 = sst [smem:[#allocation9_spill]] %s3319_s24  ;;  %s2262_s9 = sadd.s32 4294967294, %s3347_s7  }
   0xe   : > { %4658 = sst [smem:[#allocation10_spill]] %s3327_s26  ;;  %s32_s10 = sadd.s32 1, %s3339_s29 }
   0xf   : > { %4659 = sst [smem:[#allocation11_spill]] %s3339_s29  ;;  %s35_s11 = sadd.s32 1, %s3343_s30 }
  0x10   : > { %4660 = sst [smem:[#allocation12_spill]] %s3343_s30  ;;  %p33_p0 = scmp.ge.s32.totalorder %s32_s10, 2 }
  0x11   : > { %s174_s12 = sadd.s32 1, %s3327_s26  ;;  %p184_p1 = scmp.ne.s32.totalorder %s3327_s26, %s3323_s25 }
  0x12   : > { %p3457_p2 = scmp.eq.s32.totalorder %s2261_s8, 3  ;;  %s4751_s10 = smov (%p33_p0, %s32_s10), 0 }
  0x13   : > { %4662 = sst [smem:[#allocation13_spill]] %s4751_s10  ;;  %s4753_s11 = smov (!%p33_p0, %s35_s11), %s3343_s30 }
  0x14   : > { %p3466_p3 = por %p3457_p2, %p184_p1  ;;  %p190_p4 = scmp.ne.s32.totalorder %s3323_s25, %s3319_s24 }
  0x15   : > { %p37_p5 = scmp.ge.s32.totalorder %s4753_s11, 2  ;;  %p3472_p6 = scmp.eq.s32.totalorder %s2262_s9, 3 }
  0x16   : > { %s4663_s14 = scalar_select %p3466_p3, 1, 0 }
  0x17   : > { %s2269_s16 = sshll.u32 %s3343_s30, 1  ;;  %s204_s17 = sadd.s32 1, %s3315_s23 }
  0x18   : > { %4664 = sst [smem:[#allocation14_spill]] %s4663_s14  ;;  %s4755_s11 = smov (%p37_p5, %s4753_s11), 0 }
  0x19   : > { %4666 = sst [smem:[#allocation15_spill]] %s4755_s11  ;;  %p3482_p7 = por %p3472_p6, %p190_p4 }
  0x1a   : > { %s198_s19 = sadd.s32 %s3339_s29, %s2269_s16  ;;  %s171_s20 = ssub.s32 %s3343_s30, %s4755_s11 }
  0x1b   : > { %s2270_s8 = sshll.u32 %s4755_s11, 1  ;;  %p172_p8 = scmp.eq.s32.totalorder %s171_s20, 0 }
  0x1c   : > { %s200_s9 = sadd.s32 %s2270_s8, %s4751_s10  ;;  %p214_p9 = scmp.ne.s32.totalorder %s3315_s23, %s3311_s22 }
  0x1d   : > { %s201_s24 = ssub.s32 %s198_s19, %s200_s9  ;;  %p220_p12 = scmp.ne.s32.totalorder %s3311_s22, %s3307_s21 }
  0x1e   : > { %s3494_s5 = scalar_select %p172_p8, %s3327_s26, %s174_s12  }
  0x1f   : > { %p202_p10 = scmp.eq.s32.totalorder %s201_s24, 0  ;;  %p3498_p11 = por %p214_p9, %p3457_p2 }
  0x20   : > { %4668 = sst [smem:[#allocation16_spill]] %s3494_s5  ;;  %p2273_p13 = scmp.ge.s32.totalorder %s3347_s7, 1 }
  0x21   : > { %s3506_s6 = scalar_select %p202_p10, %s3315_s23, %s204_s17  }
  0x22   : > { %p3510_p0 = por %p220_p12, %p3472_p6  ;;  %p281_p1 = scmp.lt.s32.totalorder %s3347_s7, 5 }
  0x23   : > { %4670 = sst [smem:[#allocation17_spill]] %s3506_s6 }
  0x24   : > { %p282_p4 = pnand %p2273_p13, %p281_p1 }
  0x25   : > { %s4646_s24 = sand.u32 (!%p282_p4), 1, %s3323_s25   ;;  %s4648_s12 = sand.u32 (!%p282_p4), 1, %s3311_s22  }
  0x26   : > { %285 = sbr.rel (%p282_p4) target bundleno = 1194 (0x4aa), region = 40  ;;  %s2274_s13 = sshll.u32 (!%p282_p4), %s4646_s24, 8 }
  0x27   : > { %s2275_s17 = sshll.u32 (!%p282_p4), %s4648_s12, 7  ;;  %s2276_s15 = sshll.u32 (!%p282_p4), %s3335_s28, 1 }
  0x28   : > { %s3523_s19 = sadd.s32 (!%p282_p4), %s3331_s27, %s2276_s15  ;;  %s3544_s6 = scalar_lea.vmem (!%p282_p4), [#allocation2], %s2274_s13 }
  0x29   : > { %s2277_s20 = sshll.u32 (!%p282_p4), %s3523_s19, 4  ;;  %p352_p2 = scmp.lt.s32.totalorder (!%p282_p4), %s3523_s19, 3 }
  0x2a   : > { %p333_p5 = scmp.lt.s32.totalorder (!%p282_p4), %s2277_s20, 63  ;;  %s3546_s23 = scalar_lea.vmem (!%p282_p4), [#allocation4], %s2275_s17 }
  0x2b   : > { %p2283_p6 = scmp.ne.s32.totalorder (!%p282_p4), %s3331_s27, 0 }
  0x2d   : > { %s3528_s8 = scalar_select %p352_p2, %s3523_s19, 3 }
  0x2e   : > { %s4757_s20 = smov (!%p333_p5, %s2277_s20), 63  ;;  %364 = sbr.rel (%p2283_p6) target bundleno = 64 (0x40), region = 44 }
  0x2f   : > { %s354_s10 = scalar_lea.vmem %s4634_s2, %s3528_s8  ;;  %s2278_s24 = sshll.u32 %s4757_s20, 3  ;;  %v3349_v0 = vmov (!%p2283_p6), 0.0  }
  0x30   : > { %s3537_s15 = scalar_lea.vmem %s4632_s0, %s2278_s24  ;;  %s3542_s26 = scalar_lea.vmem %s4633_s1, %s2278_s24  ;;  %365 = vst [vmem:[%s3544_s6] sm:$0xff] (!%p2283_p6), %v3349_v0  ;;  %366 = vst [vmem:[%s3544_s6 + $0x8] sm:$0xff] (!%p2283_p6), %v3349_v0 }
  0x31   : > { %367 = vst [vmem:[%s3544_s6 + $0x10] sm:$0xff] (!%p2283_p6), %v3349_v0  ;;  %368 = vst [vmem:[%s3544_s6 + $0x18] sm:$0xff] (!%p2283_p6), %v3349_v0 }
  0x32   : > { %369 = vst [vmem:[%s3544_s6 + $0x20] sm:$0xff] (!%p2283_p6), %v3349_v0  ;;  %370 = vst [vmem:[%s3544_s6 + $0x28] sm:$0xff] (!%p2283_p6), %v3349_v0 }
  0x33   : > { %371 = vst [vmem:[%s3544_s6 + $0x30] sm:$0xff] (!%p2283_p6), %v3349_v0  ;;  %372 = vst [vmem:[%s3544_s6 + $0x38] sm:$0xff] (!%p2283_p6), %v3349_v0 }
  0x34   : > { %373 = vst [vmem:[%s3544_s6 + $0x40] sm:$0xff] (!%p2283_p6), %v3349_v0  ;;  %374 = vst [vmem:[%s3544_s6 + $0x48] sm:$0xff] (!%p2283_p6), %v3349_v0 }
  0x35   : > { %375 = vst [vmem:[%s3544_s6 + $0x50] sm:$0xff] %v3349_v0  ;;  %376 = vst [vmem:[%s3544_s6 + $0x58] sm:$0xff] %v3349_v0 }
  0x36   : > { %377 = vst [vmem:[%s3544_s6 + $0x60] sm:$0xff] %v3349_v0  ;;  %378 = vst [vmem:[%s3544_s6 + $0x68] sm:$0xff] %v3349_v0 }
  0x37   : > { %379 = vst [vmem:[%s3544_s6 + $0x70] sm:$0xff] %v3349_v0  ;;  %380 = vst [vmem:[%s3544_s6 + $0x78] sm:$0xff] %v3349_v0 }
  0x38   : > { %381 = vst [vmem:[%s3544_s6 + $0x80] sm:$0xff] %v3349_v0  ;;  %382 = vst [vmem:[%s3544_s6 + $0x88] sm:$0xff] %v3349_v0 }
  0x39   : > { %383 = vst [vmem:[%s3544_s6 + $0x90] sm:$0xff] %v3349_v0  ;;  %384 = vst [vmem:[%s3544_s6 + $0x98] sm:$0xff] %v3349_v0 }
  0x3a   : > { %385 = vst [vmem:[%s3544_s6 + $0xa0] sm:$0xff] %v3349_v0  ;;  %386 = vst [vmem:[%s3544_s6 + $0xa8] sm:$0xff] %v3349_v0 }
  0x3b   : > { %387 = vst [vmem:[%s3544_s6 + $0xb0] sm:$0xff] %v3349_v0  ;;  %388 = vst [vmem:[%s3544_s6 + $0xb8] sm:$0xff] %v3349_v0 }
  0x3c   : > { %389 = vst [vmem:[%s3544_s6 + $0xc0] sm:$0xff] %v3349_v0  ;;  %390 = vst [vmem:[%s3544_s6 + $0xc8] sm:$0xff] %v3349_v0 }
  0x3d   : > { %391 = vst [vmem:[%s3544_s6 + $0xd0] sm:$0xff] %v3349_v0  ;;  %392 = vst [vmem:[%s3544_s6 + $0xd8] sm:$0xff] %v3349_v0 }
  0x3e   : > { %393 = vst [vmem:[%s3544_s6 + $0xe0] sm:$0xff] %v3349_v0  ;;  %394 = vst [vmem:[%s3544_s6 + $0xe8] sm:$0xff] %v3349_v0 }
  0x3f   : > { %395 = vst [vmem:[%s3544_s6 + $0xf0] sm:$0xff] %v3349_v0  ;;  %396 = vst [vmem:[%s3544_s6 + $0xf8] sm:$0xff] %v3349_v0 }
  0x40 PF: > { %v398_v1 = vld [vmem:[%s3537_s15 + $0x8] sm:$0xff]  ;;  %v397_v2 = vld [vmem:[%s3537_s15] sm:$0xff]  ;;  %v3350_v3 = vmov 0   ;;  %v415_v6 = vld [vmem:[%s3542_s26 + $0x10] sm:$0xff]  ;;  %s2133_s8 = sshll.u32 %s3546_s23, 4  ;;  %s4732_s12 = sld [smem:[#allocation19_spill]]  ;;  %s4465_s8 = int_to_ptr.vmem [resolvable:$true] %s2133_s8 }
  0x41   : > { %3164 = vset.pattern.permute.xlu1 %v3350_v3  ;;  %3163 = vset.pattern.permute.xlu0 %v3350_v3  ;;  %v414_v4 = vld [vmem:[%s3542_s26 + $0x8] sm:$0xff]  ;;  %v413_v5 = vld [vmem:[%s3542_s26] sm:$0xff]  ;;  %v399_v7 = vld [vmem:[%s3537_s15 + $0x10] sm:$0xff]  ;;  %s4733_s17 = sand.u32 1, %s3311_s22   ;;  %s3197_s9 = scalar_lea.vmem %s4465_s8, 2048 }
  0x42   : > { %453 = vperm.xlu1 %3164, %v398_v1   ;;  %450 = vperm.xlu0 %3163, %v397_v2   ;;  %v416_v8 = vld [vmem:[%s3542_s26 + $0x18] sm:$0xff]  ;;  %v953_v10 = vld [vmem:[%s4635_s3] sm:$0xff]  ;;  %v954_v11 = vld [vmem:[%s4635_s3 + $0x10] sm:$0xff]  ;;  %s4469_s20 = scalar_lea.sflag [#allocation5], %s4733_s17  ;;  %p3198_p8 = scmp.ne.s32.totalorder %s4465_s8, %s3197_s9 }
  0x43   : > { %v400_v9 = vld [vmem:[%s3537_s15 + $0x18] sm:$0xff]  ;;  %v955_v12 = vld [vmem:[%s4635_s3 + $0x20] sm:$0xff]  ;;  %v956_v13 = vld [vmem:[%s4635_s3 + $0x30] sm:$0xff]  ;;  %v2870_v14 = vpack.c.bf16 %v954_v11, %v953_v10 }
  0x44   : > { %v1114_v15 = vld [vmem:[%s4635_s3 + $0x8] sm:$0xff]  ;;  %v1115_v16 = vld [vmem:[%s4635_s3 + $0x18] sm:$0xff]  ;;  %v2874_v17 = vpack.c.bf16 %v956_v13, %v955_v12  ;;  %v957_v21 = vld [vmem:[%s4635_s3 + $0x40] sm:$0xff]  ;;  %p3199_p9 = pnand %p3198_p8, %p3498_p11 }
  0x45   : > { %v2902_v18 = vpack.c.bf16 %v1115_v16, %v1114_v15  ;;  %v1116_v19 = vld [vmem:[%s4635_s3 + $0x28] sm:$0xff]  ;;  %v1117_v20 = vld [vmem:[%s4635_s3 + $0x38] sm:$0xff]  ;;  %v958_v22 = vld [vmem:[%s4635_s3 + $0x50] sm:$0xff]  ;;  %2871 = vmatprep.subr.bf16.mxu0 %v2870_v14 }
  0x46   : > { %549 = vperm.xlu1 %3164, %v414_v4   ;;  %546 = vperm.xlu0 %3163, %v413_v5   ;;  %v2906_v23 = vpack.c.bf16 %v1117_v20, %v1116_v19  ;;  %v1118_v24 = vld [vmem:[%s4635_s3 + $0x48] sm:$0xff]  ;;  %v417_v25 = vld [vmem:[%s3542_s26 + $0x20] sm:$0xff]  ;;  %v1119_v27 = vld [vmem:[%s4635_s3 + $0x58] sm:$0xff]  ;;  %v2878_v28 = vpack.c.bf16 %v958_v22, %v957_v21  ;;  %v430_v21 = vlaneseq  ;;  %p3200_p10 = pneg %p3199_p9 }
  0x47   : > { %v401_v26 = vld [vmem:[%s3537_s15 + $0x20] sm:$0xff]  ;;  %2903 = vmatprep.subr.bf16.mxu1 %v2902_v18  ;;  %2873 = vmatpush3.bf16.msra.mxu0 %v2870_v14  ;;  %v2910_v30 = vpack.c.bf16 %v1119_v27, %v1118_v24  ;;  %v960_v31 = vld [vmem:[%s4635_s3 + $0x70] sm:$0xff]  ;;  %v1120_v32 = vld [vmem:[%s4635_s3 + $0x68] sm:$0xff] }
  0x48   : > { %2905 = vmatpush3.bf16.msra.mxu1 %v2902_v18  ;;  %2875 = vmatprep.subr.bf16.mxu0 %v2874_v17  ;;  %v959_v29 = vld [vmem:[%s4635_s3 + $0x60] sm:$0xff]  ;;  %v1121_v33 = vld [vmem:[%s4635_s3 + $0x78] sm:$0xff]  ;;  %v418_v34 = vld [vmem:[%s3542_s26 + $0x28] sm:$0xff]  ;;  %v3716_v22 = vand.u32 127, %v430_v21 }
  0x49   : > { %2907 = vmatprep.subr.bf16.mxu1 %v2906_v23  ;;  %v402_v35 = vld [vmem:[%s3537_s15 + $0x28] sm:$0xff]  ;;  %v2882_v36 = vpack.c.bf16 %v960_v31, %v959_v29  ;;  %v961_v37 = vld [vmem:[%s4635_s3 + $0x80] sm:$0xff]  ;;  %v2914_v38 = vpack.c.bf16 %v1121_v33, %v1120_v32  ;;  %v962_v39 = vld [vmem:[%s4635_s3 + $0x90] sm:$0xff] }
  0x4a   : > { %552 = vperm.xlu1 %3164, %v415_v6   ;;  %456 = vperm.xlu0 %3163, %v399_v7   ;;  %v1122_v40 = vld [vmem:[%s4635_s3 + $0x88] sm:$0xff]  ;;  %v1123_v41 = vld [vmem:[%s4635_s3 + $0x98] sm:$0xff]  ;;  %v419_v42 = vld [vmem:[%s3542_s26 + $0x30] sm:$0xff]  ;;  %v2886_v44 = vpack.c.bf16 %v962_v39, %v961_v37 }
  0x4b   : > { %2877 = vmatpush3.bf16.msra.mxu0 %v2874_v17  ;;  %v403_v43 = vld [vmem:[%s3537_s15 + $0x30] sm:$0xff]  ;;  %v963_v45 = vld [vmem:[%s4635_s3 + $0xa0] sm:$0xff]  ;;  %v2918_v46 = vpack.c.bf16 %v1123_v41, %v1122_v40  ;;  %v1124_v48 = vld [vmem:[%s4635_s3 + $0xa8] sm:$0xff] }
  0x4c   : > { %2909 = vmatpush3.bf16.msra.mxu1 %v2906_v23  ;;  %2879 = vmatprep.subr.bf16.mxu0 %v2878_v28  ;;  %v964_v47 = vld [vmem:[%s4635_s3 + $0xb0] sm:$0xff]  ;;  %v1125_v49 = vld [vmem:[%s4635_s3 + $0xb8] sm:$0xff]  ;;  %v965_v53 = vld [vmem:[%s4635_s3 + $0xc0] sm:$0xff] }
  0x4d   : > { %2911 = vmatprep.subr.bf16.mxu1 %v2910_v30  ;;  %v420_v50 = vld [vmem:[%s3542_s26 + $0x38] sm:$0xff]  ;;  %v2890_v52 = vpack.c.bf16 %v964_v47, %v963_v45  ;;  %v2922_v54 = vpack.c.bf16 %v1125_v49, %v1124_v48  ;;  %v966_v55 = vld [vmem:[%s4635_s3 + $0xd0] sm:$0xff]  ;;  %v1126_v56 = vld [vmem:[%s4635_s3 + $0xc8] sm:$0xff] }
  0x4e   : > { %555 = vperm.xlu1 %3164, %v416_v8   ;;  %459 = vperm.xlu0 %3163, %v400_v9   ;;  %v404_v51 = vld [vmem:[%s3537_s15 + $0x38] sm:$0xff]  ;;  %v421_v58 = vld [vmem:[%s3542_s26 + $0x40] sm:$0xff]  ;;  %v2894_v60 = vpack.c.bf16 %v966_v55, %v965_v53  ;;  %v968_v63 = vld [vmem:[%s4635_s3 + $0xf0] sm:$0xff] }
  0x4f   : > { %2881 = vmatpush3.bf16.msra.mxu0 %v2878_v28  ;;  %v1127_v57 = vld [vmem:[%s4635_s3 + $0xd8] sm:$0xff]  ;;  %v405_v59 = vld [vmem:[%s3537_s15 + $0x40] sm:$0xff]  ;;  %v1128_v0 = vld [vmem:[%s4635_s3 + $0xe8] sm:$0xff] }
  0x50   : > { %2913 = vmatpush3.bf16.msra.mxu1 %v2910_v30  ;;  %2883 = vmatprep.subr.bf16.mxu0 %v2882_v36  ;;  %v967_v61 = vld [vmem:[%s4635_s3 + $0xe0] sm:$0xff]  ;;  %v2926_v62 = vpack.c.bf16 %v1127_v57, %v1126_v56  ;;  %v1129_v1 = vld [vmem:[%s4635_s3 + $0xf8] sm:$0xff]  ;;  %v422_v2 = vld [vmem:[%s3542_s26 + $0x48] sm:$0xff] }
  0x51   : > { %2915 = vmatprep.subr.bf16.mxu1 %v2914_v38  ;;  %v406_v3 = vld [vmem:[%s3537_s15 + $0x48] sm:$0xff]  ;;  %v2898_v4 = vpack.c.bf16 %v968_v63, %v967_v61  ;;  %v2930_v5 = vpack.c.bf16 %v1129_v1, %v1128_v0  ;;  %v1516_v6 = vld [vmem:[%s4636_s4] sm:$0xff]  ;;  %v423_v8 = vld [vmem:[%s3542_s26 + $0x50] sm:$0xff] }
  0x52   : > { %558 = vperm.xlu1 %3164, %v417_v25   ;;  %462 = vperm.xlu0 %3163, %v401_v26   ;;  %v1517_v7 = vld [vmem:[%s4636_s4 + $0x8] sm:$0xff]  ;;  %v407_v9 = vld [vmem:[%s3537_s15 + $0x50] sm:$0xff]  ;;  %v424_v11 = vld [vmem:[%s3542_s26 + $0x58] sm:$0xff]  ;;  %v3351_v25 = vmov 1.0  }
  0x53   : > { %2885 = vmatpush3.bf16.msra.mxu0 %v2882_v36  ;;  %v2942_v10 = vpack.c.bf16 %v1517_v7, %v1516_v6  ;;  %v408_v12 = vld [vmem:[%s3537_s15 + $0x58] sm:$0xff]  ;;  %v425_v13 = vld [vmem:[%s3542_s26 + $0x60] sm:$0xff]  ;;  %v426_v15 = vld [vmem:[%s3542_s26 + $0x68] sm:$0xff] }
  0x54   : > { %2917 = vmatpush3.bf16.msra.mxu1 %v2914_v38  ;;  %2887 = vmatprep.subr.bf16.mxu0 %v2886_v44  ;;  %v409_v14 = vld [vmem:[%s3537_s15 + $0x60] sm:$0xff]  ;;  %v410_v16 = vld [vmem:[%s3537_s15 + $0x68] sm:$0xff]  ;;  %v427_v17 = vld [vmem:[%s3542_s26 + $0x70] sm:$0xff] }
  0x55   : > { %2919 = vmatprep.subr.bf16.mxu1 %v2918_v46  ;;  %v411_v18 = vld [vmem:[%s3537_s15 + $0x70] sm:$0xff]  ;;  %v428_v19 = vld [vmem:[%s3542_s26 + $0x78] sm:$0xff]  ;;  %v1520_v31 = vld [vmem:[%s4636_s4 + $0x20] sm:$0xff] }
  0x56   : > { %561 = vperm.xlu1 %3164, %v418_v34   ;;  %465 = vperm.xlu0 %3163, %v402_v35   ;;  %v412_v20 = vld [vmem:[%s3537_s15 + $0x78] sm:$0xff]  ;;  %v1518_v26 = vld [vmem:[%s4636_s4 + $0x10] sm:$0xff]  ;;  %v1521_v32 = vld [vmem:[%s4636_s4 + $0x28] sm:$0xff] }
  0x57   : > { %2889 = vmatpush3.bf16.msra.mxu0 %v2886_v44  ;;  %v1519_v27 = vld [vmem:[%s4636_s4 + $0x18] sm:$0xff]  ;;  %v2950_v35 = vpack.c.bf16 %v1521_v32, %v1520_v31  ;;  %v1522_v36 = vld [vmem:[%s4636_s4 + $0x30] sm:$0xff]  ;;  %v1524_v41 = vld [vmem:[%s4636_s4 + $0x40] sm:$0xff] }
  0x58   : > { %2921 = vmatpush3.bf16.msra.mxu1 %v2918_v46  ;;  %2891 = vmatprep.subr.bf16.mxu0 %v2890_v52  ;;  %v2946_v30 = vpack.c.bf16 %v1519_v27, %v1518_v26  ;;  %v1523_v37 = vld [vmem:[%s4636_s4 + $0x38] sm:$0xff]  ;;  %v1526_v46 = vld [vmem:[%s4636_s4 + $0x50] sm:$0xff] }
  0x59   : > { %2923 = vmatprep.subr.bf16.mxu1 %v2922_v54  ;;  %v2954_v40 = vpack.c.bf16 %v1523_v37, %v1522_v36  ;;  %v1527_v47 = vld [vmem:[%s4636_s4 + $0x58] sm:$0xff]  ;;  %v1530_v56 = vld [vmem:[%s4636_s4 + $0x70] sm:$0xff] }
  0x5a   : > { %564 = vperm.xlu1 %3164, %v419_v42   ;;  %468 = vperm.xlu0 %3163, %v403_v43   ;;  %v1525_v42 = vld [vmem:[%s4636_s4 + $0x48] sm:$0xff]  ;;  %v1531_v57 = vld [vmem:[%s4636_s4 + $0x78] sm:$0xff] }
  0x5b   : > { %2893 = vmatpush3.bf16.msra.mxu0 %v2890_v52  ;;  %v2958_v45 = vpack.c.bf16 %v1525_v42, %v1524_v41  ;;  %v1529_v52 = vld [vmem:[%s4636_s4 + $0x68] sm:$0xff] }
  0x5c   : > { %2925 = vmatpush3.bf16.msra.mxu1 %v2922_v54  ;;  %2895 = vmatprep.subr.bf16.mxu0 %v2894_v60 }
  0x5d   : > { %2927 = vmatprep.subr.bf16.mxu1 %v2926_v62 }
  0x5e   : > { %567 = vperm.xlu1 %3164, %v420_v50   ;;  %471 = vperm.xlu0 %3163, %v404_v51   ;;  %v2962_v50 = vpack.c.bf16 %v1527_v47, %v1526_v46  ;;  %v1528_v51 = vld [vmem:[%s4636_s4 + $0x60] sm:$0xff] }
  0x5f   : > { %2897 = vmatpush3.bf16.msra.mxu0 %v2894_v60  ;;  %v2966_v55 = vpack.c.bf16 %v1529_v52, %v1528_v51  ;;  %v2970_v60 = vpack.c.bf16 %v1531_v57, %v1530_v56 }
  0x60   : > { %2929 = vmatpush3.bf16.msra.mxu1 %v2926_v62  ;;  %2899 = vmatprep.subr.bf16.mxu0 %v2898_v4 }
  0x61   : > { %2931 = vmatprep.subr.bf16.mxu1 %v2930_v5 }
  0x62   : > { %570 = vperm.xlu1 %3164, %v421_v58   ;;  %474 = vperm.xlu0 %3163, %v405_v59  }
  0x63   : > { %2901 = vmatpush3.bf16.msra.mxu0 %v2898_v4 }
  0x64   : > { %2933 = vmatpush3.bf16.msra.mxu1 %v2930_v5 }
  0x65   : > { %2943 = vmatprep.subr.bf16.mxu1 %v2942_v10 }
  0x66   : > { %573 = vperm.xlu1 %3164, %v422_v2   ;;  %477 = vperm.xlu0 %3163, %v406_v3  }
  0x6a   : > { %576 = vperm.xlu1 %3164, %v423_v8   ;;  %480 = vperm.xlu0 %3163, %v407_v9  }
  0x6e   : > { %579 = vperm.xlu1 %3164, %v424_v11   ;;  %483 = vperm.xlu0 %3163, %v408_v12  }
  0x72   : > { %582 = vperm.xlu1 %3164, %v425_v13   ;;  %486 = vperm.xlu0 %3163, %v409_v14   ;;  %v3924_v13 = vshrl.u32 %v430_v21, 7  ;;  %v710_v14 = vadd.s32 1, %v3716_v22 }
  0x74   : > { %v808_v21 = vmul.u32 8, %v3924_v13  ;;  %v4014_v41 = vadd.s32 48, %v3924_v13  ;;  %v4017_v42 = vadd.s32 56, %v3924_v13 }
  0x76   : > { %585 = vperm.xlu1 %3164, %v426_v15   ;;  %489 = vperm.xlu0 %3163, %v410_v16   ;;  %v3931_v15 = vadd.s32 8, %v3924_v13  ;;  %v693_v16 = vmul.u32 8, %v3716_v22  ;;  %v846_v51 = vadd.s32 1, %v4014_v41  ;;  %v847_v52 = vadd.s32 1, %v4017_v42 }
  0x78   : > { %v841_v26 = vadd.s32 1, %v3931_v15 }
  0x7a   : > { %588 = vperm.xlu1 %3164, %v427_v17   ;;  %492 = vperm.xlu0 %3163, %v411_v18   ;;  %v711_v17 = vmul.u32 8, %v710_v14  ;;  %v3945_v18 = vadd.s32 16, %v3924_v13 }
  0x7c   : > { %v842_v31 = vadd.s32 1, %v3945_v18 }
  0x7e   : > { %591 = vperm.xlu1 %3164, %v428_v19   ;;  %495 = vperm.xlu0 %3163, %v412_v20   ;;  %v3948_v19 = vadd.s32 24, %v3924_v13  ;;  %v3352_v20 = vmov 1.0|1.0   ;;  %v858_v36 = vmul.u32 8, %v842_v31 }
  0x80   : > { %v843_v32 = vadd.s32 1, %v3948_v19  ;;  %v811_v37 = vmul.u32 8, %v3948_v19 }
  0xc1   : > { %v454_v23 = vpop.permute.xlu1 %453  ;;  %v451_v24 = vpop.permute.xlu0 %450 }
  0xc2   : > { %vm498_vm0 = vcmp.eq.s32.totalorder %v454_v23, %v3716_v22  ;;  %vm497_vm1 = vcmp.eq.s32.totalorder %v451_v24, %v3716_v22  ;;  %v809_v23 = vmul.u32 8, %v3931_v15  ;;  %v840_v24 = vadd.s32 1, %v3924_v13 }
  0xc3   : > { %2646 = vmatprep.mubr.msk.f32.mxu0 %vm497_vm1, %v3351_v25 }
  0xc4   : > { %2647 = vmatmul.mubr.msk.f32.vlgmr.msra.gmra.mrb[0].mxu0 %vm498_vm0, %v3351_v25  ;;  %v856_v27 = vmul.u32 8, %v840_v24 }
  0xc5   : > { %v3728_v28 = vpop.permute.xlu1 %549  ;;  %v3730_v29 = vpop.permute.xlu0 %546 }
  0xc6   : > { %vm594_vm2 = vcmp.eq.s32.totalorder %v3728_v28, %v3716_v22  ;;  %vm593_vm3 = vcmp.eq.s32.totalorder %v3730_v29, %v3716_v22  ;;  %v857_v28 = vmul.u32 8, %v841_v26 }
  0xc7   : > { %2702 = vmatprep.mubr.msk.f32.mxu1 %vm593_vm3, %v3351_v25 }
  0xc8   : > { %2703 = vmatmul.mubr.msk.f32.vlgmr.msra.gmra.mrb[0].mxu1 %vm594_vm2, %v3351_v25 }
  0xc9   : > { %v3750_v33 = vpop.permute.xlu1 %552  ;;  %v457_v34 = vpop.permute.xlu0 %456  ;;  %2945 = vmatpush3.bf16.msra.mxu1 %v2942_v10 }
  0xca   : > { %vm595_vm4 = vcmp.eq.s32.totalorder %v3750_v33, %v3716_v22  ;;  %vm499_vm5 = vcmp.eq.s32.totalorder %v457_v34, %v3716_v22  ;;  %2947 = vmatprep.subr.bf16.mxu1 %v2946_v30  ;;  %v4004_v33 = vadd.s32 32, %v3924_v13  ;;  %v4007_v34 = vadd.s32 40, %v3924_v13 }
  0xcb   : > { %2649 = vmatprep.mubr.msk.f32.mxu0 %vm499_vm5, %v3351_v25  ;;  %2705 = vmatprep.mubr.msk.f32.mxu1 %vm595_vm4, %v3351_v25 }
  0xcc   : > { %v812_v47 = vmul.u32 8, %v4004_v33 }
  0xcd   : > { %v3766_v38 = vpop.permute.xlu1 %555  ;;  %v460_v39 = vpop.permute.xlu0 %459  ;;  %2949 = vmatpush3.bf16.msra.mxu1 %v2946_v30 }
  0xce   : > { %vm596_vm6 = vcmp.eq.s32.totalorder %v3766_v38, %v3716_v22  ;;  %vm500_vm7 = vcmp.eq.s32.totalorder %v460_v39, %v3716_v22  ;;  %2951 = vmatprep.subr.bf16.mxu1 %v2950_v35  ;;  %v859_v38 = vmul.u32 8, %v843_v32  ;;  %v844_v39 = vadd.s32 1, %v4004_v33 }
  0xcf   : > { %2650 = vmatmul.mubr.msk.f32.gmra.mrb[2].mxu0 %vm500_vm7, %v3351_v25  ;;  %2706 = vmatmul.mubr.msk.f32.gmra.mrb[2].mxu1 %vm596_vm6, %v3351_v25 }
  0xd1   : > { %v3782_v43 = vpop.permute.xlu1 %558  ;;  %v463_v44 = vpop.permute.xlu0 %462  ;;  %2953 = vmatpush3.bf16.msra.mxu1 %v2950_v35  ;;  %v810_v35 = vmul.u32 8, %v3945_v18 }
  0xd2   : > { %vm597_vm8 = vcmp.eq.s32.totalorder %v3782_v43, %v3716_v22  ;;  %vm501_vm9 = vcmp.eq.s32.totalorder %v463_v44, %v3716_v22  ;;  %2955 = vmatprep.subr.bf16.mxu1 %v2954_v40 }
  0xd3   : > { %2652 = vmatprep.mubr.msk.f32.mxu0 %vm501_vm9, %v3351_v25  ;;  %2708 = vmatprep.mubr.msk.f32.mxu1 %vm597_vm8, %v3351_v25 }
  0xd5   : > { %v3798_v48 = vpop.permute.xlu1 %561  ;;  %v466_v49 = vpop.permute.xlu0 %465  ;;  %2957 = vmatpush3.bf16.msra.mxu1 %v2954_v40  ;;  %v845_v40 = vadd.s32 1, %v4007_v34 }
  0xd6   : > { %vm598_vm10 = vcmp.eq.s32.totalorder %v3798_v48, %v3716_v22  ;;  %vm502_vm11 = vcmp.eq.s32.totalorder %v466_v49, %v3716_v22  ;;  %2959 = vmatprep.subr.bf16.mxu1 %v2958_v45  ;;  %v860_v48 = vmul.u32 8, %v844_v39  ;;  %v813_v49 = vmul.u32 8, %v4007_v34 }
  0xd7   : > { %2653 = vmatmul.mubr.msk.f32.gmra.mrb[4].mxu0 %vm502_vm11, %v3351_v25  ;;  %2709 = vmatmul.mubr.msk.f32.gmra.mrb[4].mxu1 %vm598_vm10, %v3351_v25 }
  0xd9   : > { %v3814_v53 = vpop.permute.xlu1 %564  ;;  %v469_v54 = vpop.permute.xlu0 %468  ;;  %2961 = vmatpush3.bf16.msra.mxu1 %v2958_v45 }
  0xda   : > { %vm599_vm12 = vcmp.eq.s32.totalorder %v3814_v53, %v3716_v22  ;;  %vm503_vm13 = vcmp.eq.s32.totalorder %v469_v54, %v3716_v22  ;;  %2963 = vmatprep.subr.bf16.mxu1 %v2962_v50 }
  0xdb   : > { %2655 = vmatprep.mubr.msk.f32.mxu0 %vm503_vm13, %v3351_v25  ;;  %2711 = vmatprep.mubr.msk.f32.mxu1 %vm599_vm12, %v3351_v25 }
  0xdd   : > { %v3830_v58 = vpop.permute.xlu1 %567  ;;  %v472_v59 = vpop.permute.xlu0 %471  ;;  %2965 = vmatpush3.bf16.msra.mxu1 %v2962_v50  ;;  %v861_v50 = vmul.u32 8, %v845_v40 }
  0xde   : > { %vm600_vm14 = vcmp.eq.s32.totalorder %v3830_v58, %v3716_v22  ;;  %vm504_vm15 = vcmp.eq.s32.totalorder %v472_v59, %v3716_v22  ;;  %2967 = vmatprep.subr.bf16.mxu1 %v2966_v55 }
  0xdf   : > { %2656 = vmatmul.mubr.msk.f32.gmra.mrb[6].mxu0 %vm504_vm15, %v3351_v25  ;;  %2712 = vmatmul.mubr.msk.f32.gmra.mrb[6].mxu1 %vm600_vm14, %v3351_v25 }
  0xe1   : > { %v571_v61 = vpop.permute.xlu1 %570  ;;  %v475_v62 = vpop.permute.xlu0 %474  ;;  %2969 = vmatpush3.bf16.msra.mxu1 %v2966_v55 }
  0xe2   : > { %vm601_vm0 = vcmp.eq.s32.totalorder %v571_v61, %v3716_v22  ;;  %vm505_vm1 = vcmp.eq.s32.totalorder %v475_v62, %v3716_v22  ;;  %2971 = vmatprep.subr.bf16.mxu1 %v2970_v60  ;;  %v862_v61 = vmul.u32 8, %v846_v51 }
  0xe3   : > { %2658 = vmatprep.mubr.msk.f32.mxu0 %vm505_vm1, %v3351_v25  ;;  %2714 = vmatprep.mubr.msk.f32.mxu1 %vm601_vm0, %v3351_v25 }
  0xe5   : > { %v574_v63 = vpop.permute.xlu1 %573  ;;  %v478_v0 = vpop.permute.xlu0 %477  ;;  %2973 = vmatpush3.bf16.msra.mxu1 %v2970_v60  ;;  %v814_v60 = vmul.u32 8, %v4014_v41 }
  0xe6   : > { %vm602_vm5 = vcmp.eq.s32.totalorder %v574_v63, %v3716_v22  ;;  %vm506_vm7 = vcmp.eq.s32.totalorder %v478_v0, %v3716_v22  ;;  %v815_v63 = vmul.u32 8, %v4017_v42  ;;  %v863_v0 = vmul.u32 8, %v847_v52 }
  0xe7   : > { %2659 = vmatmul.mubr.msk.f32.gmra.mrb[8].mxu0 %vm506_vm7, %v3351_v25  ;;  %2715 = vmatmul.mubr.msk.f32.gmra.mrb[8].mxu1 %vm602_vm5, %v3351_v25 }
  0xe9   : > { %v577_v1 = vpop.permute.xlu1 %576  ;;  %v481_v2 = vpop.permute.xlu0 %480 }
  0xea   : > { %vm603_vm9 = vcmp.eq.s32.totalorder %v577_v1, %v3716_v22  ;;  %vm507_vm11 = vcmp.eq.s32.totalorder %v481_v2, %v3716_v22 }
  0xeb   : > { %2661 = vmatprep.mubr.msk.f32.mxu0 %vm507_vm11, %v3351_v25  ;;  %2717 = vmatprep.mubr.msk.f32.mxu1 %vm603_vm9, %v3351_v25 }
  0xed   : > { %v580_v3 = vpop.permute.xlu1 %579  ;;  %v484_v4 = vpop.permute.xlu0 %483 }
  0xee   : > { %vm4652_vm13 = vcmp.eq.s32.totalorder %v580_v3, %v3716_v22  ;;  %vm508_vm15 = vcmp.eq.s32.totalorder %v484_v4, %v3716_v22 }
  0xef   : > { %2662 = vmatmul.mubr.msk.f32.gmra.mrb[10].mxu0 %vm508_vm15, %v3351_v25  ;;  %2718 = vmatmul.mubr.msk.f32.gmra.mrb[10].mxu1 %vm4652_vm13, %v3351_v25 }
  0xf1   : > { %v583_v5 = vpop.permute.xlu1 %582  ;;  %v487_v6 = vpop.permute.xlu0 %486 }
  0xf2   : > { %vm4653_vm1 = vcmp.eq.s32.totalorder %v583_v5, %v3716_v22  ;;  %vm509_vm7 = vcmp.eq.s32.totalorder %v487_v6, %v3716_v22 }
  0xf3   : > { %2664 = vmatprep.mubr.msk.f32.mxu0 %vm509_vm7, %v3351_v25  ;;  %2720 = vmatprep.mubr.msk.f32.mxu1 %vm4653_vm1, %v3351_v25 }
  0xf5   : > { %v586_v7 = vpop.permute.xlu1 %585  ;;  %v490_v8 = vpop.permute.xlu0 %489 }
  0xf6   : > { %vm606_vm11 = vcmp.eq.s32.totalorder %v586_v7, %v3716_v22  ;;  %vm510_vm15 = vcmp.eq.s32.totalorder %v490_v8, %v3716_v22 }
  0xf7   : > { %2665 = vmatmul.mubr.msk.f32.gmra.mrb[12].mxu0 %vm510_vm15, %v3351_v25  ;;  %2721 = vmatmul.mubr.msk.f32.gmra.mrb[12].mxu1 %vm606_vm11, %v3351_v25 }
  0xf9   : > { %v589_v9 = vpop.permute.xlu1 %588  ;;  %v493_v10 = vpop.permute.xlu0 %492 }
  0xfa   : > { %vm607_vm7 = vcmp.eq.s32.totalorder %v589_v9, %v3716_v22  ;;  %vm511_vm13 = vcmp.eq.s32.totalorder %v493_v10, %v3716_v22 }
  0xfb   : > { %2667 = vmatprep.mubr.msk.f32.mxu0 %vm511_vm13, %v3351_v25  ;;  %2723 = vmatprep.mubr.msk.f32.mxu1 %vm607_vm7, %v3351_v25  ;;  %vm714_vm13 = vcmp.lt.s32.totalorder %v3945_v18, %v711_v17 }
  0xfd   : > { %v592_v11 = vpop.permute.xlu1 %591  ;;  %v496_v12 = vpop.permute.xlu0 %495 }
  0xfe   : > { %vm608_vm15 = vcmp.eq.s32.totalorder %v592_v11, %v3716_v22  ;;  %vm512_vm1 = vcmp.eq.s32.totalorder %v496_v12, %v3716_v22 }
  0xff   : > { %2668 = vmatmul.mubr.msk.f32.gmra.mrb[14].mxu0 %vm512_vm1, %v3351_v25  ;;  %2724 = vmatmul.mubr.msk.f32.gmra.mrb[14].mxu1 %vm608_vm15, %v3351_v25  ;;  %vm715_vm1 = vcmp.lt.s32.totalorder %v3948_v19, %v711_v17 }
 0x100   : > { %2790 = vmatprep.mubr.msk.f32.mxu1 %vm593_vm3, %v3351_v25  ;;  %vm695_vm3 = vcmp.ge.s32.totalorder %v3931_v15, %v693_v16 }
 0x103   : > { %2791 = vmatmul.mubr.msk.f32.vlgmr.msra.gmra.mrb[16].mxu1 %vm594_vm2, %v3351_v25  ;;  %vm694_vm2 = vcmp.ge.s32.totalorder %v3924_v13, %v693_v16 }
 0x104   : > { %2793 = vmatprep.mubr.msk.f32.mxu1 %vm595_vm4, %v3351_v25  ;;  %vm712_vm4 = vcmp.lt.s32.totalorder %v3924_v13, %v711_v17 }
 0x107   : > { %2794 = vmatmul.mubr.msk.f32.gmra.mrb[18].mxu1 %vm596_vm6, %v3351_v25  ;;  %vm713_vm6 = vcmp.lt.s32.totalorder %v3931_v15, %v711_v17 }
 0x108   : > { %2796 = vmatprep.mubr.msk.f32.mxu1 %vm597_vm8, %v3351_v25  ;;  %vm728_vm8 = vmand %vm694_vm2, %vm712_vm4 }
 0x10b   : > { %2797 = vmatmul.mubr.msk.f32.gmra.mrb[20].mxu1 %vm598_vm10, %v3351_v25  ;;  %vm4672_vm10 = vcmp.eq.s32.totalorder %v580_v3, %v3716_v22 }
 0x10c   : > { %2799 = vmatprep.mubr.msk.f32.mxu1 %vm599_vm12, %v3351_v25  ;;  %vm729_vm12 = vmand %vm695_vm3, %vm713_vm6  ;;  %vm872_vm6 = vcmp.lt.s32.totalorder %v3716_v22, %v856_v27 }
 0x10f   : > { %2800 = vmatmul.mubr.msk.f32.gmra.mrb[22].mxu1 %vm600_vm14, %v3351_v25  ;;  %vm4673_vm14 = vcmp.eq.s32.totalorder %v583_v5, %v3716_v22 }
 0x110   : > { %2802 = vmatprep.mubr.msk.f32.mxu1 %vm601_vm0, %v3351_v25  ;;  %vm2934_vm0 = vmpackc.low %vm729_vm12, %vm728_vm8  ;;  %vm873_vm8 = vcmp.lt.s32.totalorder %v3716_v22, %v857_v28 }
 0x111   : > { %2935 = vmatprep.subr.msk.bf16.mxu0 %vm2934_vm0, %v3352_v20 }
 0x112   : > { %2937 = vmatpush3.bf16.msk.msra.mxu0 %vm2934_vm0, %v3352_v20 }
 0x113   : > { %2803 = vmatmul.mubr.msk.f32.gmra.mrb[24].mxu1 %vm602_vm5, %v3351_v25  ;;  %vm696_vm5 = vcmp.ge.s32.totalorder %v3945_v18, %v693_v16 }
 0x114   : > { %2805 = vmatprep.mubr.msk.f32.mxu1 %vm603_vm9, %v3351_v25  ;;  %vm697_vm9 = vcmp.ge.s32.totalorder %v3948_v19, %v693_v16  ;;  %vm730_vm2 = vmand %vm696_vm5, %vm714_vm13  ;;  %vm4025_vm13 = vcmp.lt.s32.totalorder %v3716_v22, %v858_v36 }
 0x115   : > { %vm731_vm3 = vmand %vm697_vm9, %vm715_vm1  ;;  %vm4020_vm9 = vcmp.ge.s32.totalorder %v3716_v22, %v810_v35  ;;  %vm4030_vm1 = vcmp.ge.s32.totalorder %v3716_v22, %v811_v37 }
 0x116   : > { %vm2938_vm4 = vmpackc.low %vm731_vm3, %vm730_vm2  ;;  %vm4035_vm2 = vcmp.lt.s32.totalorder %v3716_v22, %v859_v38 }
 0x117   : > { %2806 = vmatmul.mubr.msk.f32.gmra.mrb[26].mxu1 %vm4672_vm10, %v3351_v25  ;;  %2939 = vmatprep.subr.msk.bf16.mxu0 %vm2938_vm4, %v3352_v20  ;;  %vm890_vm3 = vmand %vm4020_vm9, %vm4025_vm13 }
 0x118   : > { %2808 = vmatprep.mubr.msk.f32.mxu1 %vm4673_vm14, %v3351_v25  ;;  %2941 = vmatpush3.bf16.msk.msra.mxu0 %vm2938_vm4, %v3352_v20  ;;  %vm891_vm4 = vmand %vm4030_vm1, %vm4035_vm2  ;;  %vm4098_vm2 = vcmp.ge.s32.totalorder %v3716_v22, %v814_v60 }
 0x11b   : > { %2809 = vmatmul.mubr.msk.f32.gmra.mrb[28].mxu1 %vm606_vm11, %v3351_v25  ;;  %vm824_vm11 = vcmp.ge.s32.totalorder %v3716_v22, %v808_v21 }
 0x11c   : > { %2811 = vmatprep.mubr.msk.f32.mxu1 %vm607_vm7, %v3351_v25  ;;  %vm825_vm7 = vcmp.ge.s32.totalorder %v3716_v22, %v809_v23  ;;  %vm888_vm10 = vmand %vm824_vm11, %vm872_vm6  ;;  %vm4052_vm11 = vcmp.ge.s32.totalorder %v3716_v22, %v812_v47 }
 0x11d   : > { %vm889_vm12 = vmand %vm825_vm7, %vm873_vm8  ;;  %vm4057_vm7 = vcmp.lt.s32.totalorder %v3716_v22, %v860_v48  ;;  %vm4068_vm8 = vcmp.ge.s32.totalorder %v3716_v22, %v813_v49 }
 0x11e   : > { %vm892_vm9 = vmand %vm4052_vm11, %vm4057_vm7  ;;  %vm4114_vm11 = vcmp.ge.s32.totalorder %v3716_v22, %v815_v63  ;;  %vm4119_vm7 = vcmp.lt.s32.totalorder %v3716_v22, %v863_v0 }
 0x11f   : > { %2812 = vmatmul.mubr.msk.f32.gmra.mrb[30].mxu1 %vm608_vm15, %v3351_v25  ;;  %vm904_vm15 = vcmp.lt.s32.totalorder %v3716_v22, 32 }
 0x120   : > { %vm3981_vm14 = vmand %vm888_vm10, %vm904_vm15  ;;  %vm4073_vm10 = vcmp.lt.s32.totalorder %v3716_v22, %v861_v50 }
 0x121   : > { %vm3987_vm0 = vmand %vm889_vm12, %vm904_vm15 }
 0x122   : > { %vm2974_vm5 = vmpackc.low %vm3987_vm0, %vm3981_vm14 }
 0x123   : > { %2975 = vmatprep.subr.msk.bf16.mxu0 %vm2974_vm5, %v3352_v20  ;;  %vm4063_vm6 = vmand %vm890_vm3, %vm904_vm15  ;;  %vm4103_vm3 = vcmp.lt.s32.totalorder %v3716_v22, %v862_v61 }
 0x124   : > { %vm4080_vm12 = vmand %vm891_vm4, %vm904_vm15 }
 0x125   : > { %vm893_vm13 = vmand %vm4068_vm8, %vm4073_vm10 }
 0x126   : > { %vm2978_vm1 = vmpackc.low %vm4080_vm12, %vm4063_vm6 }
 0x127   : > { %vm4109_vm4 = vmand %vm892_vm9, %vm904_vm15 }
 0x128   : > { %vm4125_vm8 = vmand %vm893_vm13, %vm904_vm15 }
 0x129   : > { %vm894_vm10 = vmand %vm4098_vm2, %vm4103_vm3 }
 0x12a   : > { %vm895_vm9 = vmand %vm4114_vm11, %vm4119_vm7 }
 0x12b   : > { %vm2982_vm14 = vmpackc.low %vm4125_vm8, %vm4109_vm4 }
 0x12c   : > { %vm4155_vm0 = vmand %vm894_vm10, %vm904_vm15 }
 0x197   : > { %v2648_v53 = vpop.f32.mrb[0].mxu0 }
 0x198   : > { %v1035_v54 = vpop.f32.mrb[1].mxu0 }
 0x19b   : > { %v2704_v1 = vpop.f32.mrb[0].mxu1 }
 0x19c   : > { %v1276_v2 = vmul.f32 %v2704_v1, %v2648_v53  ;;  %v1196_v3 = vpop.f32.mrb[1].mxu1 }
 0x19d   : > { %v1275_v4 = vmul.f32 %v1196_v3, %v1035_v54 }
 0x19f   : > { %2734 = vmatprep.mubr.f32.mxu0 %v1275_v4 }
 0x1a0   : > { %2735 = vmatmul.mubr.f32.vlgmr.msra.gmra.mrb[16].mxu0 %v1276_v2 }
 0x1a1   : > { %2977 = vmatpush3.bf16.msk.msra.mxu0 %vm2974_vm5, %v3352_v20  ;;  %vm912_vm5 = vmand %vm895_vm9, %vm904_vm15 }
 0x1a2   : > { %v2651_v11 = vpop.f32.mrb[2].mxu0  ;;  %v2707_v12 = vpop.f32.mrb[2].mxu1  ;;  %2979 = vmatprep.subr.msk.bf16.mxu0 %vm2978_vm1, %v3352_v20  ;;  %vm2986_vm13 = vmpackc.low %vm912_vm5, %vm4155_vm0 }
 0x1a3   : > { %v1278_v14 = vmul.f32 %v2707_v12, %v2651_v11  ;;  %v1045_v16 = vpop.f32.mrb[3].mxu0  ;;  %v1206_v17 = vpop.f32.mrb[3].mxu1 }
 0x1a4   : > { %v1277_v23 = vmul.f32 %v1206_v17, %v1045_v16  ;;  %v4201_v16 = vadd.s32 72, %v3924_v13 }
 0x1a5   : > { %2981 = vmatpush3.bf16.msk.msra.mxu0 %vm2978_vm1, %v3352_v20 }
 0x1a6   : > { %2737 = vmatprep.mubr.f32.mxu0 %v1277_v23  ;;  %2983 = vmatprep.subr.msk.bf16.mxu0 %vm2982_vm14, %v3352_v20  ;;  %v849_v21 = vadd.s32 1, %v4201_v16 }
 0x1a7   : > { %2738 = vmatmul.mubr.f32.gmra.mrb[18].mxu0 %v1278_v14  ;;  %v4198_v14 = vadd.s32 64, %v3924_v13 }
 0x1a9   : > { %2985 = vmatpush3.bf16.msk.msra.mxu0 %vm2982_vm14, %v3352_v20  ;;  %v848_v17 = vadd.s32 1, %v4198_v14 }
 0x1aa   : > { %v2654_v24 = vpop.f32.mrb[4].mxu0  ;;  %v2710_v26 = vpop.f32.mrb[4].mxu1  ;;  %2987 = vmatprep.subr.msk.bf16.mxu0 %vm2986_vm13, %v3352_v20 }
 0x1ab   : > { %v1280_v27 = vmul.f32 %v2710_v26, %v2654_v24  ;;  %v1055_v28 = vpop.f32.mrb[5].mxu0  ;;  %v1216_v29 = vpop.f32.mrb[5].mxu1  ;;  %v816_v26 = vmul.u32 8, %v4198_v14 }
 0x1ac   : > { %v1279_v30 = vmul.f32 %v1216_v29, %v1055_v28  ;;  %v4212_v28 = vadd.s32 80, %v3924_v13  ;;  %v4215_v29 = vadd.s32 88, %v3924_v13 }
 0x1ad   : > { %2989 = vmatpush3.bf16.msk.msra.mxu0 %vm2986_vm13, %v3352_v20  ;;  %vm4218_vm6 = vcmp.ge.s32.totalorder %v3716_v22, %v816_v26 }
 0x1ae   : > { %2740 = vmatprep.mubr.f32.mxu0 %v1279_v30  ;;  %v864_v30 = vmul.u32 8, %v848_v17 }
 0x1af   : > { %2741 = vmatmul.mubr.f32.gmra.mrb[20].mxu0 %v1280_v27  ;;  %v817_v27 = vmul.u32 8, %v4201_v16 }
 0x1b0   : > { %vm880_vm1 = vcmp.lt.s32.totalorder %v3716_v22, %v864_v30 }
 0x1b1   : > { %vm4223_vm12 = vcmp.ge.s32.totalorder %v3716_v22, %v817_v27  ;;  %vm896_vm3 = vmand %vm4218_vm6, %vm880_vm1 }
 0x1b2   : > { %v2657_v31 = vpop.f32.mrb[6].mxu0  ;;  %v2713_v32 = vpop.f32.mrb[6].mxu1  ;;  %vm4255_vm11 = vmand %vm896_vm3, %vm904_vm15 }
 0x1b3   : > { %v1282_v35 = vmul.f32 %v2713_v32, %v2657_v31  ;;  %v1065_v36 = vpop.f32.mrb[7].mxu0  ;;  %v1226_v37 = vpop.f32.mrb[7].mxu1  ;;  %v865_v31 = vmul.u32 8, %v849_v21 }
 0x1b4   : > { %v1281_v38 = vmul.f32 %v1226_v37, %v1065_v36  ;;  %v850_v36 = vadd.s32 1, %v4212_v28  ;;  %v851_v37 = vadd.s32 1, %v4215_v29 }
 0x1b5   : > { %vm4233_vm2 = vcmp.lt.s32.totalorder %v3716_v22, %v865_v31 }
 0x1b6   : > { %2743 = vmatprep.mubr.f32.mxu0 %v1281_v38  ;;  %vm897_vm4 = vmand %vm4223_vm12, %vm4233_vm2 }
 0x1b7   : > { %2744 = vmatmul.mubr.f32.gmra.mrb[22].mxu0 %v1282_v35  ;;  %vm914_vm8 = vmand %vm897_vm4, %vm904_vm15 }
 0x1b8   : > { %vm2990_vm0 = vmpackc.low %vm914_vm8, %vm4255_vm11 }
 0x1b9   : > { %2991 = vmatprep.subr.msk.bf16.mxu0 %vm2990_vm0, %v3352_v20 }
 0x1ba   : > { %v2660_v39 = vpop.f32.mrb[8].mxu0  ;;  %v2716_v40 = vpop.f32.mrb[8].mxu1  ;;  %2993 = vmatpush3.bf16.msk.msra.mxu0 %vm2990_vm0, %v3352_v20 }
 0x1bb   : > { %v1284_v43 = vmul.f32 %v2716_v40, %v2660_v39  ;;  %v1075_v44 = vpop.f32.mrb[9].mxu0  ;;  %v1236_v45 = vpop.f32.mrb[9].mxu1 }
 0x1bc   : > { %v1283_v46 = vmul.f32 %v1236_v45, %v1075_v44  ;;  %v819_v44 = vmul.u32 8, %v4215_v29  ;;  %v4244_v45 = vadd.s32 96, %v3924_v13 }
 0x1be   : > { %2746 = vmatprep.mubr.f32.mxu0 %v1283_v46  ;;  %v4247_v46 = vadd.s32 104, %v3924_v13  ;;  %vm4269_vm10 = vcmp.ge.s32.totalorder %v3716_v22, %v819_v44 }
 0x1bf   : > { %2747 = vmatmul.mubr.f32.gmra.mrb[24].mxu0 %v1284_v43  ;;  %v818_v43 = vmul.u32 8, %v4212_v28 }
 0x1c1   : > { %vm4260_vm7 = vcmp.ge.s32.totalorder %v3716_v22, %v818_v43 }
 0x1c2   : > { %v2663_v47 = vpop.f32.mrb[10].mxu0  ;;  %v2719_v48 = vpop.f32.mrb[10].mxu1 }
 0x1c3   : > { %v1286_v49 = vmul.f32 %v2719_v48, %v2663_v47  ;;  %v1085_v50 = vpop.f32.mrb[11].mxu0  ;;  %v1246_v51 = vpop.f32.mrb[11].mxu1  ;;  %v866_v47 = vmul.u32 8, %v850_v36  ;;  %v867_v48 = vmul.u32 8, %v851_v37 }
 0x1c4   : > { %v1285_v52 = vmul.f32 %v1246_v51, %v1085_v50  ;;  %v852_v51 = vadd.s32 1, %v4244_v45 }
 0x1c5   : > { %vm4274_vm9 = vcmp.lt.s32.totalorder %v3716_v22, %v866_v47  ;;  %vm4279_vm14 = vcmp.lt.s32.totalorder %v3716_v22, %v867_v48 }
 0x1c6   : > { %2749 = vmatprep.mubr.f32.mxu0 %v1285_v52  ;;  %v853_v52 = vadd.s32 1, %v4247_v46  ;;  %vm898_vm5 = vmand %vm4260_vm7, %vm4274_vm9 }
 0x1c7   : > { %2750 = vmatmul.mubr.f32.gmra.mrb[26].mxu0 %v1286_v49  ;;  %vm899_vm13 = vmand %vm4269_vm10, %vm4279_vm14 }
 0x1c8   : > { %vm915_vm6 = vmand %vm898_vm5, %vm904_vm15 }
 0x1c9   : > { %vm916_vm2 = vmand %vm899_vm13, %vm904_vm15 }
 0x1ca   : > { %v2666_v53 = vpop.f32.mrb[12].mxu0  ;;  %v2722_v54 = vpop.f32.mrb[12].mxu1  ;;  %vm2994_vm11 = vmpackc.low %vm916_vm2, %vm915_vm6 }
 0x1cb   : > { %v1288_v55 = vmul.f32 %v2722_v54, %v2666_v53  ;;  %v1095_v56 = vpop.f32.mrb[13].mxu0  ;;  %v1256_v57 = vpop.f32.mrb[13].mxu1  ;;  %2995 = vmatprep.subr.msk.bf16.mxu0 %vm2994_vm11, %v3352_v20 }
 0x1cc   : > { %v1287_v58 = vmul.f32 %v1256_v57, %v1095_v56  ;;  %v820_v56 = vmul.u32 8, %v4244_v45  ;;  %v821_v57 = vmul.u32 8, %v4247_v46  ;;  %2997 = vmatpush3.bf16.msk.msra.mxu0 %vm2994_vm11, %v3352_v20 }
 0x1ce   : > { %2752 = vmatprep.mubr.f32.mxu0 %v1287_v58  ;;  %v4288_v58 = vadd.s32 112, %v3924_v13  ;;  %vm4308_vm12 = vcmp.ge.s32.totalorder %v3716_v22, %v820_v56  ;;  %vm4316_vm3 = vcmp.ge.s32.totalorder %v3716_v22, %v821_v57 }
 0x1cf   : > { %2753 = vmatmul.mubr.f32.gmra.mrb[28].mxu0 %v1288_v55 }
 0x1d0   : > { %v822_v21 = vmul.u32 8, %v4288_v58 }
 0x1d2   : > { %v2669_v59 = vpop.f32.mrb[14].mxu0  ;;  %v2725_v60 = vpop.f32.mrb[14].mxu1  ;;  %vm838_vm9 = vcmp.ge.s32.totalorder %v3716_v22, %v822_v21 }
 0x1d3   : > { %v1290_v61 = vmul.f32 %v2725_v60, %v2669_v59  ;;  %v1105_v62 = vpop.f32.mrb[15].mxu0  ;;  %v1266_v63 = vpop.f32.mrb[15].mxu1  ;;  %v4291_v59 = vadd.s32 120, %v3924_v13  ;;  %v868_v60 = vmul.u32 8, %v852_v51 }
 0x1d4   : > { %v1289_v0 = vmul.f32 %v1266_v63, %v1105_v62  ;;  %v854_v62 = vadd.s32 1, %v4288_v58 }
 0x1d5   : > { %v855_v63 = vadd.s32 1, %v4291_v59  ;;  %vm884_vm1 = vcmp.lt.s32.totalorder %v3716_v22, %v868_v60  ;;  %v823_v26 = vmul.u32 8, %v4291_v59 }
 0x1d6   : > { %2755 = vmatprep.mubr.f32.mxu0 %v1289_v0  ;;  %v4173_v1 = vpop.f32.mrb[16].mxu1  ;;  %v870_v27 = vmul.u32 8, %v854_v62  ;;  %vm900_vm7 = vmand %vm4308_vm12, %vm884_vm1 }
 0x1d7   : > { %2756 = vmatmul.mubr.f32.gmra.mrb[30].mxu0 %v1290_v61  ;;  %v4175_v2 = vpop.f32.mrb[17].mxu1  ;;  %v869_v61 = vmul.u32 8, %v853_v52  ;;  %v871_v30 = vmul.u32 8, %v855_v63  ;;  %vm917_vm10 = vmand %vm900_vm7, %vm904_vm15  ;;  %vm839_vm5 = vcmp.ge.s32.totalorder %v3716_v22, %v823_v26 }
 0x1d8   : > { %vm886_vm14 = vcmp.lt.s32.totalorder %v3716_v22, %v870_v27 }
 0x1d9   : > { %vm885_vm4 = vcmp.lt.s32.totalorder %v3716_v22, %v869_v61  ;;  %vm887_vm13 = vcmp.lt.s32.totalorder %v3716_v22, %v871_v30  ;;  %vm902_vm12 = vmand %vm838_vm9, %vm886_vm14 }
 0x1da   : > { %v4177_v3 = vpop.f32.mrb[18].mxu1  ;;  %vm901_vm8 = vmand %vm4316_vm3, %vm885_vm4 }
 0x1db   : > { %v4179_v4 = vpop.f32.mrb[19].mxu1  ;;  %vm918_vm0 = vmand %vm901_vm8, %vm904_vm15 }
 0x1dc   : > { %vm2998_vm6 = vmpackc.low %vm918_vm0, %vm917_vm10 }
 0x1dd   : > { %2999 = vmatprep.subr.msk.bf16.mxu0 %vm2998_vm6, %v3352_v20  ;;  %vm903_vm1 = vmand %vm839_vm5, %vm887_vm13 }
 0x1de   : > { %v4181_v5 = vpop.f32.mrb[20].mxu1  ;;  %3001 = vmatpush3.bf16.msk.msra.mxu0 %vm2998_vm6, %v3352_v20  ;;  %vm919_vm2 = vmand %vm902_vm12, %vm904_vm15 }
 0x1df   : > { %v4183_v6 = vpop.f32.mrb[21].mxu1  ;;  %vm920_vm3 = vmand %vm903_vm1, %vm904_vm15 }
 0x1e0   : > { %vm3002_vm4 = vmpackc.low %vm920_vm3, %vm919_vm2 }
 0x1e1   : > { %3003 = vmatprep.subr.msk.bf16.mxu0 %vm3002_vm4, %v3352_v20 }
 0x1e2   : > { %v4185_v7 = vpop.f32.mrb[22].mxu1  ;;  %3005 = vmatpush3.bf16.msk.msra.mxu0 %vm3002_vm4, %v3352_v20 }
 0x1e3   : > { %v4187_v8 = vpop.f32.mrb[23].mxu1 }
 0x1e6   : > { %v4189_v9 = vpop.f32.mrb[24].mxu1 }
 0x1e7   : > { %v4191_v10 = vpop.f32.mrb[25].mxu1 }
 0x1ea   : > { %v4193_v11 = vpop.f32.mrb[26].mxu1 }
 0x1eb   : > { %v4195_v12 = vpop.f32.mrb[27].mxu1 }
 0x1ee   : > { %v4205_v23 = vpop.f32.mrb[28].mxu1 }
 0x1ef   : > { %v4207_v24 = vpop.f32.mrb[29].mxu1 }
 0x1f2   : > { %v4229_v38 = vpop.f32.mrb[30].mxu1 }
 0x1f3   : > { %v4237_v40 = vpop.f32.mrb[31].mxu1 }
 0x273   : > { %v2736_v31 = vpop.f32.mrb[16].mxu0 }
 0x274   : > { %v2390_v32 = vclamps-f32 %v2736_v31, 10.0  ;;  %v1357_v35 = vpop.f32.mrb[17].mxu0 }
 0x275   : > { %v2389_v36 = vclamps-f32 %v1357_v35, 10.0 }
 0x276   : > { %v1470_v37 = vmul.f32 1.442695, %v2390_v32 }
 0x277   : > { %v1468_v39 = vmul.f32 1.442695, %v2389_v36 }
 0x278   : > { %3165 = vpow2.f32 %v1470_v37 }
 0x279   : > { %3167 = vpow2.f32 %v1468_v39 }
 0x27a   : > { %v2739_v43 = vpop.f32.mrb[18].mxu0 }
 0x27b   : > { %v2392_v44 = vclamps-f32 %v2739_v43, 10.0  ;;  %v1367_v47 = vpop.f32.mrb[19].mxu0 }
 0x27c   : > { %v2391_v22 = vclamps-f32 %v1367_v47, 10.0 }
 0x27d   : > { %v1474_v48 = vmul.f32 1.442695, %v2392_v44 }
 0x27e   : > { %v1472_v49 = vmul.f32 1.442695, %v2391_v22 }
 0x27f   : > { %3169 = vpow2.f32 %v1474_v48 }
 0x280   : > { %3171 = vpow2.f32 %v1472_v49 }
 0x282   : > { %v3166_v50 = vpop.eup %3165  ;;  %v2742_v20 = vpop.f32.mrb[20].mxu0 }
 0x283   : > { %v3168_v51 = vpop.eup %3167  ;;  %1501 = vst [vmem:[%s3546_s23 + $0x8] sm:$0xff] %v3166_v50  ;;  %v2394_v52 = vclamps-f32 %v2742_v20, 10.0  ;;  %v1377_v53 = vpop.f32.mrb[21].mxu0 }
 0x284   : > { %1500 = vst [vmem:[%s3546_s23] sm:$0xff] %v3168_v51  ;;  %v2393_v54 = vclamps-f32 %v1377_v53, 10.0  ;;  %2846 = vmatprep.mubr.f32.mxu0 %v3168_v51  ;;  %v3006_v55 = vpack.c.bf16 %v3166_v50, %v3168_v51 }
 0x285   : > { %v1478_v56 = vmul.f32 1.442695, %v2394_v52  ;;  %2847 = vmatmul.mubr.f32.vlgmr.msra.gmra.mrb[32].mxu0 %v3166_v50 }
 0x286   : > { %v1476_v57 = vmul.f32 1.442695, %v2393_v54  ;;  %3007 = vmatprep.subr.bf16.mxu0 %v3006_v55  ;;  %3038 = vmatprep.subr.bf16.mxu1 %v3006_v55 }
 0x287   : > { %3173 = vpow2.f32 %v1478_v56 }
 0x288   : > { %3175 = vpow2.f32 %v1476_v57 }
 0x289   : > { %v3170_v60 = vpop.eup %3169 }
 0x28a   : > { %v3172_v61 = vpop.eup %3171  ;;  %1503 = vst [vmem:[%s3546_s23 + $0x18] sm:$0xff] %v3170_v60  ;;  %v2745_v62 = vpop.f32.mrb[22].mxu0 }
 0x28b   : > { %1502 = vst [vmem:[%s3546_s23 + $0x10] sm:$0xff] %v3172_v61  ;;  %v2396_v63 = vclamps-f32 %v2745_v62, 10.0  ;;  %v1387_v0 = vpop.f32.mrb[23].mxu0  ;;  %2849 = vmatprep.mubr.f32.mxu0 %v3172_v61  ;;  %v4349_v17 = vpack.c.bf16 %v3170_v60, %v3172_v61 }
 0x28c   : > { %v2395_v21 = vclamps-f32 %v1387_v0, 10.0  ;;  %2850 = vmatmul.mubr.f32.gmra.mrb[34].mxu0 %v3170_v60 }
 0x28d   : > { %v1482_v26 = vmul.f32 1.442695, %v2396_v63 }
 0x28e   : > { %v1480_v27 = vmul.f32 1.442695, %v2395_v21 }
 0x28f   : > { %3177 = vpow2.f32 %v1482_v26 }
 0x290   : > { %3179 = vpow2.f32 %v1480_v27 }
 0x291   : > { %v3174_v30 = vpop.eup %3173 }
 0x292   : > { %v3176_v31 = vpop.eup %3175  ;;  %1505 = vst [vmem:[%s3546_s23 + $0x28] sm:$0xff] %v3174_v30  ;;  %v2748_v32 = vpop.f32.mrb[24].mxu0 }
 0x293   : > { %1504 = vst [vmem:[%s3546_s23 + $0x20] sm:$0xff] %v3176_v31  ;;  %v2398_v35 = vclamps-f32 %v2748_v32, 10.0  ;;  %v1397_v36 = vpop.f32.mrb[25].mxu0  ;;  %2852 = vmatprep.mubr.f32.mxu0 %v3176_v31  ;;  %v4353_v37 = vpack.c.bf16 %v3174_v30, %v3176_v31 }
 0x294   : > { %v2397_v39 = vclamps-f32 %v1397_v36, 10.0  ;;  %2853 = vmatmul.mubr.f32.gmra.mrb[36].mxu0 %v3174_v30 }
 0x295   : > { %v1486_v43 = vmul.f32 1.442695, %v2398_v35 }
 0x296   : > { %v1484_v44 = vmul.f32 1.442695, %v2397_v39 }
 0x297   : > { %3181 = vpow2.f32 %v1486_v43 }
 0x298   : > { %3183 = vpow2.f32 %v1484_v44 }
 0x299   : > { %v3178_v47 = vpop.eup %3177 }
 0x29a   : > { %v3180_v22 = vpop.eup %3179  ;;  %1507 = vst [vmem:[%s3546_s23 + $0x38] sm:$0xff] %v3178_v47  ;;  %v2751_v48 = vpop.f32.mrb[26].mxu0 }
 0x29b   : > { %1506 = vst [vmem:[%s3546_s23 + $0x30] sm:$0xff] %v3180_v22  ;;  %v2400_v49 = vclamps-f32 %v2751_v48, 10.0  ;;  %v1407_v50 = vpop.f32.mrb[27].mxu0  ;;  %2855 = vmatprep.mubr.f32.mxu0 %v3180_v22  ;;  %v4357_v20 = vpack.c.bf16 %v3178_v47, %v3180_v22 }
 0x29c   : > { %v2399_v51 = vclamps-f32 %v1407_v50, 10.0  ;;  %2856 = vmatmul.mubr.f32.gmra.mrb[38].mxu0 %v3178_v47  ;;  %v3353_v50 = vmov 0.0  }
 0x29d   : > { %v1490_v52 = vmul.f32 1.442695, %v2400_v49  ;;  %1958 = vmatprep.mubr.f32.mxu1 %v3353_v50 }
 0x29e   : > { %v1488_v53 = vmul.f32 1.442695, %v2399_v51 }
 0x29f   : > { %3185 = vpow2.f32 %v1490_v52 }
 0x2a0   : > { %3187 = vpow2.f32 %v1488_v53 }
 0x2a1   : > { %v3182_v54 = vpop.eup %3181 }
 0x2a2   : > { %v3184_v55 = vpop.eup %3183  ;;  %1509 = vst [vmem:[%s3546_s23 + $0x48] sm:$0xff] %v3182_v54  ;;  %v2754_v56 = vpop.f32.mrb[28].mxu0 }
 0x2a3   : > { %1508 = vst [vmem:[%s3546_s23 + $0x40] sm:$0xff] %v3184_v55  ;;  %v2402_v57 = vclamps-f32 %v2754_v56, 10.0  ;;  %v1417_v60 = vpop.f32.mrb[29].mxu0  ;;  %2858 = vmatprep.mubr.f32.mxu0 %v3184_v55  ;;  %v4361_v61 = vpack.c.bf16 %v3182_v54, %v3184_v55 }
 0x2a4   : > { %v2401_v62 = vclamps-f32 %v1417_v60, 10.0  ;;  %2859 = vmatmul.mubr.f32.gmra.mrb[40].mxu0 %v3182_v54 }
 0x2a5   : > { %v1494_v63 = vmul.f32 1.442695, %v2402_v57 }
 0x2a6   : > { %v1492_v0 = vmul.f32 1.442695, %v2401_v62 }
 0x2a7   : > { %3189 = vpow2.f32 %v1494_v63 }
 0x2a8   : > { %3191 = vpow2.f32 %v1492_v0 }
 0x2a9   : > { %v3186_v21 = vpop.eup %3185 }
 0x2aa   : > { %v3188_v26 = vpop.eup %3187  ;;  %1511 = vst [vmem:[%s3546_s23 + $0x58] sm:$0xff] %v3186_v21  ;;  %v2757_v27 = vpop.f32.mrb[30].mxu0 }
 0x2ab   : > { %1510 = vst [vmem:[%s3546_s23 + $0x50] sm:$0xff] %v3188_v26  ;;  %v2404_v30 = vclamps-f32 %v2757_v27, 10.0  ;;  %v1427_v31 = vpop.f32.mrb[31].mxu0  ;;  %2861 = vmatprep.mubr.f32.mxu0 %v3188_v26  ;;  %v4365_v32 = vpack.c.bf16 %v3186_v21, %v3188_v26 }
 0x2ac   : > { %v2403_v35 = vclamps-f32 %v1427_v31, 10.0  ;;  %2862 = vmatmul.mubr.f32.gmra.mrb[42].mxu0 %v3186_v21 }
 0x2ad   : > { %v1498_v36 = vmul.f32 1.442695, %v2404_v30 }
 0x2ae   : > { %v1496_v39 = vmul.f32 1.442695, %v2403_v35 }
 0x2af   : > { %3193 = vpow2.f32 %v1498_v36 }
 0x2b0   : > { %3195 = vpow2.f32 %v1496_v39 }
 0x2b1   : > { %v3190_v43 = vpop.eup %3189 }
 0x2b2   : > { %v3192_v44 = vpop.eup %3191  ;;  %1513 = vst [vmem:[%s3546_s23 + $0x68] sm:$0xff] %v3190_v43 }
 0x2b3   : > { %1512 = vst [vmem:[%s3546_s23 + $0x60] sm:$0xff] %v3192_v44  ;;  %2864 = vmatprep.mubr.f32.mxu0 %v3192_v44  ;;  %v4369_v47 = vpack.c.bf16 %v3190_v43, %v3192_v44 }
 0x2b4   : > { %2865 = vmatmul.mubr.f32.gmra.mrb[44].mxu0 %v3190_v43 }
 0x2b9   : > { %v3194_v22 = vpop.eup %3193 }
 0x2ba   : > { %v3196_v48 = vpop.eup %3195  ;;  %1515 = vst [vmem:[%s3546_s23 + $0x78] sm:$0xff] %v3194_v22 }
 0x2bb   : > { %1514 = vst [vmem:[%s3546_s23 + $0x70] sm:$0xff] %v3196_v48  ;;  %2867 = vmatprep.mubr.f32.mxu0 %v3196_v48  ;;  %v4373_v49 = vpack.c.bf16 %v3194_v22, %v3196_v48 }
 0x2bc   : > { %2868 = vmatmul.mubr.f32.gmra.mrb[46].mxu0 %v3194_v22 }
 0x2bd   : > { %1934 = vmatprep.mubr.f32.mxu0 %v3353_v50 }
 0x358   : > { %v2848_v51 = vpop.f32.mrb[32].mxu0 }
 0x359   : > { %v1823_v52 = vmul.f32 %v2848_v51, %v4173_v1  ;;  %v1743_v53 = vpop.f32.mrb[33].mxu0 }
 0x35a   : > { %v1822_v54 = vmul.f32 %v1743_v53, %v4175_v2 }
 0x35c   : > { %v3008_v55 = vpack.c.bf16 %v1823_v52, %v1822_v54 }
 0x35e   : > { %3009 = vmatpush1.bf16.msra.mxu0 %v3008_v55  ;;  %3046 = vmatpush1.bf16.msra.mxu1 %v3008_v55 }
 0x35f   : > { %v2851_v56 = vpop.f32.mrb[34].mxu0  ;;  %3011 = vmatprep.subr.bf16.mxu0 %v4349_v17  ;;  %3039 = vmatprep.subr.bf16.mxu1 %v4349_v17 }
 0x360   : > { %v1825_v57 = vmul.f32 %v2851_v56, %v4177_v3  ;;  %v1753_v60 = vpop.f32.mrb[35].mxu0 }
 0x361   : > { %v1824_v62 = vmul.f32 %v1753_v60, %v4179_v4 }
 0x363   : > { %v3012_v63 = vpack.c.bf16 %v1825_v57, %v1824_v62 }
 0x365   : > { %3013 = vmatpush1.bf16.msra.mxu0 %v3012_v63  ;;  %3047 = vmatpush1.bf16.msra.mxu1 %v3012_v63 }
 0x366   : > { %3015 = vmatprep.subr.bf16.mxu0 %v4353_v37  ;;  %3040 = vmatprep.subr.bf16.mxu1 %v4353_v37 }
 0x367   : > { %v2854_v1 = vpop.f32.mrb[36].mxu0 }
 0x368   : > { %v1827_v2 = vmul.f32 %v2854_v1, %v4181_v5  ;;  %v1763_v0 = vpop.f32.mrb[37].mxu0 }
 0x369   : > { %v1826_v21 = vmul.f32 %v1763_v0, %v4183_v6 }
 0x36b   : > { %v3016_v26 = vpack.c.bf16 %v1827_v2, %v1826_v21 }
 0x36d   : > { %3017 = vmatpush1.bf16.msra.mxu0 %v3016_v26  ;;  %3048 = vmatpush1.bf16.msra.mxu1 %v3016_v26 }
 0x36e   : > { %3019 = vmatprep.subr.bf16.mxu0 %v4357_v20  ;;  %3041 = vmatprep.subr.bf16.mxu1 %v4357_v20 }
 0x36f   : > { %v2857_v3 = vpop.f32.mrb[38].mxu0 }
 0x370   : > { %v1829_v4 = vmul.f32 %v2857_v3, %v4185_v7  ;;  %v1773_v17 = vpop.f32.mrb[39].mxu0 }
 0x371   : > { %v1828_v27 = vmul.f32 %v1773_v17, %v4187_v8 }
 0x373   : > { %v3020_v37 = vpack.c.bf16 %v1829_v4, %v1828_v27 }
 0x375   : > { %3021 = vmatpush1.bf16.msra.mxu0 %v3020_v37  ;;  %3049 = vmatpush1.bf16.msra.mxu1 %v3020_v37 }
 0x376   : > { %3023 = vmatprep.subr.bf16.mxu0 %v4361_v61  ;;  %3042 = vmatprep.subr.bf16.mxu1 %v4361_v61 }
 0x377   : > { %v2860_v5 = vpop.f32.mrb[40].mxu0 }
 0x378   : > { %v1831_v6 = vmul.f32 %v2860_v5, %v4189_v9  ;;  %v1783_v30 = vpop.f32.mrb[41].mxu0 }
 0x379   : > { %v1830_v31 = vmul.f32 %v1783_v30, %v4191_v10 }
 0x37b   : > { %v3024_v20 = vpack.c.bf16 %v1831_v6, %v1830_v31 }
 0x37d   : > { %3025 = vmatpush1.bf16.msra.mxu0 %v3024_v20  ;;  %3050 = vmatpush1.bf16.msra.mxu1 %v3024_v20 }
 0x37e   : > { %3027 = vmatprep.subr.bf16.mxu0 %v4365_v32  ;;  %3043 = vmatprep.subr.bf16.mxu1 %v4365_v32 }
 0x37f   : > { %v2863_v7 = vpop.f32.mrb[42].mxu0 }
 0x380   : > { %v1833_v8 = vmul.f32 %v2863_v7, %v4193_v11  ;;  %v1793_v35 = vpop.f32.mrb[43].mxu0 }
 0x381   : > { %v1832_v36 = vmul.f32 %v1793_v35, %v4195_v12 }
 0x383   : > { %v3028_v61 = vpack.c.bf16 %v1833_v8, %v1832_v36 }
 0x385   : > { %3029 = vmatpush1.bf16.msra.mxu0 %v3028_v61  ;;  %3051 = vmatpush1.bf16.msra.mxu1 %v3028_v61 }
 0x386   : > { %3031 = vmatprep.subr.bf16.mxu0 %v4369_v47  ;;  %3044 = vmatprep.subr.bf16.mxu1 %v4369_v47 }
 0x387   : > { %v2866_v9 = vpop.f32.mrb[44].mxu0 }
 0x388   : > { %v1835_v10 = vmul.f32 %v2866_v9, %v4205_v23  ;;  %v1803_v39 = vpop.f32.mrb[45].mxu0  ;;  %v2316_v23 = vld [vmem:[%s354_s10] ss:$0 sm:$0xff]  ;;  %s2465_s10 = sshll.u32 %s3523_s19, 11  ;;  %s3354_s19 = smov [#allocation4]  }
 0x389   : > { %v1834_v32 = vmul.f32 %v1803_v39, %v4207_v24  ;;  %vm649_vm15 = vcmp.eq.s32.totalorder %v2316_v23, %v4004_v33  ;;  %vm645_vm11 = vcmp.eq.s32.totalorder %v2316_v23, %v3924_v13  ;;  %vm650_vm7 = vcmp.eq.s32.totalorder %v2316_v23, %v4007_v34  ;;  %s4463_s13 = scalar_lea.hbm %s4732_s12, %s2465_s10  ;;  %s3201_s23 = sshll.u32 %s3354_s19, 4  ;;  %s3202_s23 = int_to_ptr.vmem [resolvable:$false] %s3201_s23 }
 0x38a   : > { %vm646_vm8 = vcmp.eq.s32.totalorder %v2316_v23, %v3931_v15  ;;  %vm651_vm10 = vcmp.eq.s32.totalorder %v2316_v23, %v4014_v41  ;;  %vm647_vm9 = vcmp.eq.s32.totalorder %v2316_v23, %v3945_v18  ;;  %vm652_vm14 = vcmp.eq.s32.totalorder %v2316_v23, %v4017_v42  ;;  %s3203_s5 = scalar_lea.vmem %s3202_s23, 4096  ;;  %p3204_p12 = scmp.lt.s32.totalorder %s4465_s8, %s3202_s23 }
 0x38b   : > { %v3032_v43 = vpack.c.bf16 %v1835_v10, %v1834_v32  ;;  %vm648_vm0 = vcmp.eq.s32.totalorder %v2316_v23, %v3948_v19  ;;  %vm653_vm5 = vcmp.eq.s32.totalorder %v2316_v23, %v4198_v14  ;;  %vm654_vm13 = vcmp.eq.s32.totalorder %v2316_v23, %v4201_v16  ;;  %p3205_p13 = scmp.lt.s32.totalorder %s3203_s5, %s3197_s9 }
 0x38c   : > { %vm655_vm6 = vcmp.eq.s32.totalorder %v2316_v23, %v4212_v28  ;;  %vm656_vm12 = vcmp.eq.s32.totalorder %v2316_v23, %v4215_v29  ;;  %vm657_vm1 = vcmp.eq.s32.totalorder %v2316_v23, %v4244_v45  ;;  %vm658_vm2 = vcmp.eq.s32.totalorder %v2316_v23, %v4247_v46 }
 0x38d   : > { %3033 = vmatpush1.bf16.msra.mxu0 %v3032_v43  ;;  %3052 = vmatpush1.bf16.msra.mxu1 %v3032_v43  ;;  %vm659_vm3 = vcmp.eq.s32.totalorder %v2316_v23, %v4288_v58  ;;  %vm660_vm4 = vcmp.eq.s32.totalorder %v2316_v23, %v4291_v59  ;;  %p3206_p1 = por %p3205_p13, %p3204_p12 }
 0x38e   : > { %3035 = vmatprep.subr.bf16.mxu0 %v4373_v49  ;;  %3045 = vmatprep.subr.bf16.mxu1 %v4373_v49 }
 0x38f   : > { %v2869_v11 = vpop.f32.mrb[46].mxu0  ;;  %p3207_p4 = pnand %p3206_p1, %p3200_p10 }
 0x390   : > { %v1837_v12 = vmul.f32 %v2869_v11, %v4229_v38  ;;  %v1813_v44 = vpop.f32.mrb[47].mxu0 }
 0x391   : > { %v1836_v22 = vmul.f32 %v1813_v44, %v4237_v40 }
 0x393   : > { %v3036_v47 = vpack.c.bf16 %v1837_v12, %v1836_v22 }
 0x395   : > { %3037 = vmatpush1.bf16.msra.mxu0 %v3036_v47  ;;  %3053 = vmatpush1.bf16.msra.mxu1 %v3036_v47 }
 0x398   : > { %2441 = vmatmul.mubr.msk.f32.vlgmr.msra.gmra.mrb[32].mxu1 %vm649_vm15, %v3351_v25  ;;  %2437 = vmatmul.mubr.msk.f32.vlgmr.msra.gmra.mrb[48].mxu0 %vm645_vm11, %v3351_v25 }
 0x399   : > { %1964 = vmatprep.mubr.f32.mxu1 %v3353_v50  ;;  %1940 = vmatprep.mubr.f32.mxu0 %v3353_v50 }
 0x39c   : > { %2442 = vmatmul.mubr.msk.f32.gmra.mrb[34].mxu1 %vm650_vm7, %v3351_v25  ;;  %2438 = vmatmul.mubr.msk.f32.gmra.mrb[50].mxu0 %vm646_vm8, %v3351_v25 }
 0x39d   : > { %1970 = vmatprep.mubr.f32.mxu1 %v3353_v50  ;;  %1946 = vmatprep.mubr.f32.mxu0 %v3353_v50 }
 0x3a0   : > { %2443 = vmatmul.mubr.msk.f32.gmra.mrb[36].mxu1 %vm651_vm10, %v3351_v25  ;;  %2439 = vmatmul.mubr.msk.f32.gmra.mrb[52].mxu0 %vm647_vm9, %v3351_v25 }
 0x3a1   : > { %1976 = vmatprep.mubr.f32.mxu1 %v3353_v50  ;;  %1952 = vmatprep.mubr.f32.mxu0 %v3353_v50 }
 0x3a4   : > { %2444 = vmatmul.mubr.msk.f32.gmra.mrb[38].mxu1 %vm652_vm14, %v3351_v25  ;;  %2440 = vmatmul.mubr.msk.f32.gmra.mrb[54].mxu0 %vm648_vm0, %v3351_v25 }
 0x3a5   : > { %1982 = vmatprep.mubr.f32.mxu1 %v3353_v50 }
 0x3a8   : > { %2445 = vmatmul.mubr.msk.f32.gmra.mrb[40].mxu1 %vm653_vm5, %v3351_v25 }
 0x3a9   : > { %1988 = vmatprep.mubr.f32.mxu1 %v3353_v50 }
 0x3ac   : > { %2446 = vmatmul.mubr.msk.f32.gmra.mrb[42].mxu1 %vm654_vm13, %v3351_v25 }
 0x3ad   : > { %1994 = vmatprep.mubr.f32.mxu1 %v3353_v50 }
 0x3b0   : > { %2447 = vmatmul.mubr.msk.f32.gmra.mrb[44].mxu1 %vm655_vm6, %v3351_v25 }
 0x3b1   : > { %2000 = vmatprep.mubr.f32.mxu1 %v3353_v50 }
 0x3b4   : > { %2448 = vmatmul.mubr.msk.f32.gmra.mrb[46].mxu1 %vm656_vm12, %v3351_v25 }
 0x3b5   : > { %2006 = vmatprep.mubr.f32.mxu1 %v3353_v50 }
 0x3b8   : > { %2449 = vmatmul.mubr.msk.f32.gmra.mrb[48].mxu1 %vm657_vm1, %v3351_v25 }
 0x3b9   : > { %2012 = vmatprep.mubr.f32.mxu1 %v3353_v50 }
 0x3bc   : > { %2450 = vmatmul.mubr.msk.f32.gmra.mrb[50].mxu1 %vm658_vm2, %v3351_v25 }
 0x3bd   : > { %2018 = vmatprep.mubr.f32.mxu1 %v3353_v50 }
 0x3c0   : > { %2451 = vmatmul.mubr.msk.f32.gmra.mrb[52].mxu1 %vm659_vm3, %v3351_v25 }
 0x3c1   : > { %2024 = vmatprep.mubr.f32.mxu1 %v3353_v50 }
 0x3c4   : > { %2452 = vmatmul.mubr.msk.f32.gmra.mrb[54].mxu1 %vm660_vm4, %v3351_v25 }
 0x3c5   : > { %3210 = shalt.err (!%p3207_p4)
}
 0x3c6   : > { %s3211_s27 = scalar_lea.hbm %s4463_s13, 2048  ;;  %s3215_s26 = scalar_lea.hbm %s4732_s12, 8192 }
 0x3c7   : > { %p3212_p2 = scmp.ne.s32.totalorder %s4463_s13, %s3211_s27  ;;  %p3216_p8 = scmp.lt.u32.totalorder %s4463_s13, %s4732_s12 }
 0x3c8   : > { %p3217_p9 = scmp.lt.u32.totalorder %s3215_s26, %s3211_s27  ;;  %p3219_p12 = scmp.lt.u32.totalorder %s3211_s27, %s4463_s13 }
 0x3c9   : > { %p3213_p5 = pnand %p3212_p2, %p3498_p11 }
 0x3ca   : > { %p3218_p10 = por %p3217_p9, %p3216_p8 }
 0x3cb   : > { %p3214_p6 = pneg %p3213_p5 }
 0x3cc   : > { %p3220_p13 = por %p3219_p12, %p3218_p10 }
 0x3ce   : > { %p3221_p1 = pnand %p3220_p13, %p3214_p6 }
 0x3d0   : > { %3224 = shalt.err (!%p3221_p1)
}
 0x3d1   : > { %s3355_s11 = smov 128   ;;  %s3356_s24 = smov 8   ;;  %v1846_v25 = vld [vmem:[%s3544_s6 + $0x40] sm:$0xff]  ;;  %v1847_v15 = vld [vmem:[%s3544_s6 + $0x48] sm:$0xff]  ;;  %v1848_v24 = vld [vmem:[%s3544_s6 + $0x50] sm:$0xff] }
 0x3d2   : > { %3055 = dma.vmem_to_hbm [thread:$0]  (%p3498_p11), %s4465_s8, 2048, %s4463_s13, %s4469_s20, %s3355_s11, %s3355_s11, %s3356_s24  }
 0x3d3   : > { %v1838_v13 = vld [vmem:[%s3544_s6] sm:$0xff]  ;;  %v1839_v18 = vld [vmem:[%s3544_s6 + $0x8] sm:$0xff]  ;;  %v1840_v29 = vld [vmem:[%s3544_s6 + $0x10] sm:$0xff]  ;;  %s2464_s14 = sshll.u32 %s3335_s28, 12  ;;  %s2115_s13 = sshll.u32 %s3544_s6, 4  ;;  %s4562_s13 = int_to_ptr.vmem [resolvable:$true] %s2115_s13 }
 0x3d4   : > { %v1849_v38 = vld [vmem:[%s3544_s6 + $0x58] sm:$0xff]  ;;  %v1850_v51 = vld [vmem:[%s3544_s6 + $0x60] sm:$0xff]  ;;  %v1851_v54 = vld [vmem:[%s3544_s6 + $0x68] sm:$0xff]  ;;  %s4735_s9 = sld [smem:[#allocation18_spill]]  ;;  %s4736_s28 = sand.u32 1, %s3323_s25  }
 0x3d5   : > { %v1841_v40 = vld [vmem:[%s3544_s6 + $0x18] sm:$0xff]  ;;  %v1842_v53 = vld [vmem:[%s3544_s6 + $0x20] sm:$0xff]  ;;  %v1843_v55 = vld [vmem:[%s3544_s6 + $0x28] sm:$0xff]  ;;  %s4568_s23 = scalar_lea.sflag [#allocation3], %s4736_s28  ;;  %s3225_s5 = scalar_lea.vmem %s4562_s13, 4096 }
 0x3d6   : > { %v1852_v0 = vld [vmem:[%s3544_s6 + $0x70] sm:$0xff]  ;;  %v1853_v3 = vld [vmem:[%s3544_s6 + $0x78] sm:$0xff]  ;;  %v1854_v20 = vld [vmem:[%s3544_s6 + $0x80] sm:$0xff]  ;;  %p3226_p11 = scmp.ne.s32.totalorder %s4562_s13, %s3225_s5  ;;  %s3357_s27 = smov [#allocation2]  }
 0x3d7   : > { %v1844_v26 = vld [vmem:[%s3544_s6 + $0x30] sm:$0xff]  ;;  %v1845_v4 = vld [vmem:[%s3544_s6 + $0x38] sm:$0xff]  ;;  %v1855_v8 = vld [vmem:[%s3544_s6 + $0x88] sm:$0xff]  ;;  %s3229_s29 = sshll.u32 %s3357_s27, 4  ;;  %s3230_s29 = int_to_ptr.vmem [resolvable:$false] %s3229_s29 }
 0x3d8   : > { %v1856_v10 = vld [vmem:[%s3544_s6 + $0x90] sm:$0xff]  ;;  %v1857_v39 = vld [vmem:[%s3544_s6 + $0x98] sm:$0xff]  ;;  %v1858_v44 = vld [vmem:[%s3544_s6 + $0xa0] sm:$0xff]  ;;  %p3227_p4 = pnand %p3226_p11, %p3466_p3  ;;  %s3231_s30 = scalar_lea.vmem %s3230_s29, 8192 }
 0x3d9   : > { %v1859_v22 = vld [vmem:[%s3544_s6 + $0xa8] sm:$0xff]  ;;  %p3232_p5 = scmp.lt.s32.totalorder %s4562_s13, %s3230_s29  ;;  %p3233_p6 = scmp.lt.s32.totalorder %s3231_s30, %s3225_s5 }
 0x3da   : > { %s4560_s19 = scalar_lea.hbm %s4735_s9, %s2464_s14  ;;  %p3228_p2 = pneg %p3227_p4 }
 0x3db   : > { %p3234_p8 = por %p3233_p6, %p3232_p5 }
 0x3dd   : > { %p3235_p9 = pnand %p3234_p8, %p3228_p2 }
 0x46b   : > { %v1960_v19 = vpop.f32.mrb[32].mxu1  ;;  %v1936_v33 = vpop.f32.mrb[48].mxu0 }
 0x46c   : > { %v2039_v34 = vadd.f32 %v1960_v19, %v1846_v25  ;;  %v1962_v41 = vpop.f32.mrb[33].mxu1  ;;  %v2031_v42 = vadd.f32 %v1936_v33, %v1838_v13  ;;  %v1938_v14 = vpop.f32.mrb[49].mxu0 }
 0x46d   : > { %v2040_v16 = vadd.f32 %v1962_v41, %v1847_v15  ;;  %v2032_v28 = vadd.f32 %v1938_v14, %v1839_v18  ;;  %v1860_v15 = vld [vmem:[%s3544_s6 + $0xb0] sm:$0xff]  ;;  %v1861_v18 = vld [vmem:[%s3544_s6 + $0xb8] sm:$0xff]  ;;  %v1863_v14 = vld [vmem:[%s3544_s6 + $0xc8] sm:$0xff] }
 0x46e   : > { %2071 = vst [vmem:[%s3544_s6 + $0x40] sm:$0xff] %v2039_v34  ;;  %2063 = vst [vmem:[%s3544_s6] sm:$0xff] %v2031_v42  ;;  %v1862_v42 = vld [vmem:[%s3544_s6 + $0xc0] sm:$0xff] }
 0x46f   : > { %2072 = vst [vmem:[%s3544_s6 + $0x48] sm:$0xff] %v2040_v16  ;;  %v1966_v45 = vpop.f32.mrb[34].mxu1  ;;  %2064 = vst [vmem:[%s3544_s6 + $0x8] sm:$0xff] %v2032_v28  ;;  %v1942_v46 = vpop.f32.mrb[50].mxu0 }
 0x470   : > { %v2041_v58 = vadd.f32 %v1966_v45, %v1848_v24  ;;  %v1968_v59 = vpop.f32.mrb[35].mxu1  ;;  %v2033_v48 = vadd.f32 %v1942_v46, %v1840_v29  ;;  %v1944_v49 = vpop.f32.mrb[51].mxu0 }
 0x471   : > { %v2042_v50 = vadd.f32 %v1968_v59, %v1849_v38  ;;  %v2034_v52 = vadd.f32 %v1944_v49, %v1841_v40  ;;  %v1864_v38 = vld [vmem:[%s3544_s6 + $0xd0] sm:$0xff]  ;;  %v1865_v40 = vld [vmem:[%s3544_s6 + $0xd8] sm:$0xff]  ;;  %v1867_v49 = vld [vmem:[%s3544_s6 + $0xe8] sm:$0xff] }
 0x472   : > { %2073 = vst [vmem:[%s3544_s6 + $0x50] sm:$0xff] %v2041_v58  ;;  %2065 = vst [vmem:[%s3544_s6 + $0x10] sm:$0xff] %v2033_v48  ;;  %v1866_v48 = vld [vmem:[%s3544_s6 + $0xe0] sm:$0xff] }
 0x473   : > { %2074 = vst [vmem:[%s3544_s6 + $0x58] sm:$0xff] %v2042_v50  ;;  %v1972_v56 = vpop.f32.mrb[36].mxu1  ;;  %2066 = vst [vmem:[%s3544_s6 + $0x18] sm:$0xff] %v2034_v52  ;;  %v1948_v57 = vpop.f32.mrb[52].mxu0 }
 0x474   : > { %v2043_v60 = vadd.f32 %v1972_v56, %v1850_v51  ;;  %v1974_v62 = vpop.f32.mrb[37].mxu1  ;;  %v2035_v63 = vadd.f32 %v1948_v57, %v1842_v53  ;;  %v1950_v1 = vpop.f32.mrb[53].mxu0 }
 0x475   : > { %v2044_v2 = vadd.f32 %v1974_v62, %v1851_v54  ;;  %v2036_v21 = vadd.f32 %v1950_v1, %v1843_v55  ;;  %v1868_v54 = vld [vmem:[%s3544_s6 + $0xf0] sm:$0xff]  ;;  %v1869_v55 = vld [vmem:[%s3544_s6 + $0xf8] sm:$0xff] }
 0x476   : > { %2075 = vst [vmem:[%s3544_s6 + $0x60] sm:$0xff] %v2043_v60  ;;  %2067 = vst [vmem:[%s3544_s6 + $0x20] sm:$0xff] %v2035_v63 }
 0x477   : > { %2076 = vst [vmem:[%s3544_s6 + $0x68] sm:$0xff] %v2044_v2  ;;  %v1978_v17 = vpop.f32.mrb[38].mxu1  ;;  %2068 = vst [vmem:[%s3544_s6 + $0x28] sm:$0xff] %v2036_v21  ;;  %v1954_v27 = vpop.f32.mrb[54].mxu0 }
 0x478   : > { %v2045_v37 = vadd.f32 %v1978_v17, %v1852_v0  ;;  %v1980_v5 = vpop.f32.mrb[39].mxu1  ;;  %v2037_v6 = vadd.f32 %v1954_v27, %v1844_v26  ;;  %v1956_v30 = vpop.f32.mrb[55].mxu0 }
 0x479   : > { %v2046_v31 = vadd.f32 %v1980_v5, %v1853_v3  ;;  %v2038_v7 = vadd.f32 %v1956_v30, %v1845_v4 }
 0x47a   : > { %2077 = vst [vmem:[%s3544_s6 + $0x70] sm:$0xff] %v2045_v37  ;;  %2069 = vst [vmem:[%s3544_s6 + $0x30] sm:$0xff] %v2037_v6 }
 0x47b   : > { %2078 = vst [vmem:[%s3544_s6 + $0x78] sm:$0xff] %v2046_v31  ;;  %v1984_v35 = vpop.f32.mrb[40].mxu1  ;;  %2070 = vst [vmem:[%s3544_s6 + $0x38] sm:$0xff] %v2038_v7 }
 0x47c   : > { %v2047_v36 = vadd.f32 %v1984_v35, %v1854_v20  ;;  %v1986_v61 = vpop.f32.mrb[41].mxu1 }
 0x47d   : > { %v2048_v9 = vadd.f32 %v1986_v61, %v1855_v8 }
 0x47e   : > { %2079 = vst [vmem:[%s3544_s6 + $0x80] sm:$0xff] %v2047_v36 }
 0x47f   : > { %2080 = vst [vmem:[%s3544_s6 + $0x88] sm:$0xff] %v2048_v9  ;;  %v1990_v32 = vpop.f32.mrb[42].mxu1 }
 0x480   : > { %v2049_v43 = vadd.f32 %v1990_v32, %v1856_v10  ;;  %v1992_v11 = vpop.f32.mrb[43].mxu1 }
 0x481   : > { %v2050_v12 = vadd.f32 %v1992_v11, %v1857_v39 }
 0x482   : > { %2081 = vst [vmem:[%s3544_s6 + $0x90] sm:$0xff] %v2049_v43 }
 0x483   : > { %2082 = vst [vmem:[%s3544_s6 + $0x98] sm:$0xff] %v2050_v12  ;;  %v1996_v23 = vpop.f32.mrb[44].mxu1 }
 0x484   : > { %v2051_v47 = vadd.f32 %v1996_v23, %v1858_v44  ;;  %v1998_v25 = vpop.f32.mrb[45].mxu1 }
 0x485   : > { %v2052_v13 = vadd.f32 %v1998_v25, %v1859_v22 }
 0x486   : > { %2083 = vst [vmem:[%s3544_s6 + $0xa0] sm:$0xff] %v2051_v47 }
 0x487   : > { %2084 = vst [vmem:[%s3544_s6 + $0xa8] sm:$0xff] %v2052_v13  ;;  %v2002_v19 = vpop.f32.mrb[46].mxu1 }
 0x488   : > { %v2053_v33 = vadd.f32 %v2002_v19, %v1860_v15  ;;  %v2004_v34 = vpop.f32.mrb[47].mxu1 }
 0x489   : > { %v2054_v41 = vadd.f32 %v2004_v34, %v1861_v18 }
 0x48a   : > { %2085 = vst [vmem:[%s3544_s6 + $0xb0] sm:$0xff] %v2053_v33 }
 0x48b   : > { %2086 = vst [vmem:[%s3544_s6 + $0xb8] sm:$0xff] %v2054_v41  ;;  %v2008_v16 = vpop.f32.mrb[48].mxu1 }
 0x48c   : > { %v2055_v24 = vadd.f32 %v2008_v16, %v1862_v42  ;;  %v2010_v28 = vpop.f32.mrb[49].mxu1 }
 0x48d   : > { %v2056_v29 = vadd.f32 %v2010_v28, %v1863_v14 }
 0x48e   : > { %2087 = vst [vmem:[%s3544_s6 + $0xc0] sm:$0xff] %v2055_v24 }
 0x48f   : > { %2088 = vst [vmem:[%s3544_s6 + $0xc8] sm:$0xff] %v2056_v29  ;;  %v2014_v45 = vpop.f32.mrb[50].mxu1 }
 0x490   : > { %v2057_v46 = vadd.f32 %v2014_v45, %v1864_v38  ;;  %v2016_v58 = vpop.f32.mrb[51].mxu1 }
 0x491   : > { %v2058_v59 = vadd.f32 %v2016_v58, %v1865_v40 }
 0x492   : > { %2089 = vst [vmem:[%s3544_s6 + $0xd0] sm:$0xff] %v2057_v46 }
 0x493   : > { %2090 = vst [vmem:[%s3544_s6 + $0xd8] sm:$0xff] %v2058_v59  ;;  %v2020_v50 = vpop.f32.mrb[52].mxu1 }
 0x494   : > { %v2059_v51 = vadd.f32 %v2020_v50, %v1866_v48  ;;  %v2022_v52 = vpop.f32.mrb[53].mxu1 }
 0x495   : > { %v2060_v53 = vadd.f32 %v2022_v52, %v1867_v49 }
 0x496   : > { %2091 = vst [vmem:[%s3544_s6 + $0xe0] sm:$0xff] %v2059_v51 }
 0x497   : > { %2092 = vst [vmem:[%s3544_s6 + $0xe8] sm:$0xff] %v2060_v53  ;;  %v2026_v56 = vpop.f32.mrb[54].mxu1 }
 0x498   : > { %v2061_v57 = vadd.f32 %v2026_v56, %v1868_v54  ;;  %v2028_v60 = vpop.f32.mrb[55].mxu1 }
 0x499   : > { %v2062_v62 = vadd.f32 %v2028_v60, %v1869_v55 }
 0x49a   : > { %2093 = vst [vmem:[%s3544_s6 + $0xf0] sm:$0xff] %v2061_v57 }
 0x49b   : > { %2094 = vst [vmem:[%s3544_s6 + $0xf8] sm:$0xff] %v2062_v62 }
 0x49c   : > { %3238 = shalt.err (!%p3235_p9)
}
 0x49d   : > { %s3239_s6 = scalar_lea.hbm %s4560_s19, 4096  ;;  %s3243_s10 = scalar_lea.hbm %s4735_s9, 8192 }
 0x49e   : > { %p3240_p10 = scmp.ne.s32.totalorder %s4560_s19, %s3239_s6  ;;  %p3244_p1 = scmp.lt.u32.totalorder %s4560_s19, %s4735_s9 }
 0x49f   : > { %p3245_p11 = scmp.lt.u32.totalorder %s3243_s10, %s3239_s6  ;;  %p3247_p2 = scmp.lt.u32.totalorder %s3239_s6, %s4560_s19 }
 0x4a0   : > { %p3241_p12 = pnand %p3240_p10, %p3466_p3 }
 0x4a1   : > { %p3246_p4 = por %p3245_p11, %p3244_p1 }
 0x4a2   : > { %p3242_p13 = pneg %p3241_p12 }
 0x4a3   : > { %p3248_p5 = por %p3247_p2, %p3246_p4 }
 0x4a5   : > { %p3249_p6 = pnand %p3248_p5, %p3242_p13 }
 0x4a7   : > { %3252 = shalt.err (!%p3249_p6)
}
 0x4a8   : > { %s3358_s14 = smov 256   ;;  %s3359_s17 = smov 16  }
 0x4a9   : > { %3054 = dma.vmem_to_hbm [thread:$0]  (%p3466_p3), %s4562_s13, 4096, %s4560_s19, %s4568_s23, %s3358_s14, %s3358_s14, %s3359_s17  }
 0x4aa PF: > { %s4737_s20 = sld [smem:[#allocation9_spill]]  ;;  %p3065_p8 = scmp.ge.s32.totalorder %s3347_s7, 2 }
 0x4ac   : > { %p3059_p9 = pnand %p3065_p8, %p3482_p7 }
 0x4b0   : > { %s2148_s28 = sand.u32 1, %s4737_s20  }
 0x4b1   : > { %s2149_s5 = scalar_lea.sflag [#allocation3], %s2148_s28 }
 0x4b2   : > { %3298 = dma.done.wait (!%p3059_p9), %s2149_s5, 4096  }
 0x4b3   : > { %3300 = vsyncadd (!%p3059_p9), %s2149_s5, 4294963200  ;;  %s2157_s27 = sand.u32 1, %s3307_s21   ;;  %p3062_p10 = pnand %p3065_p8, %p3510_p0 }
 0x4b4   : > { %s2158_s29 = scalar_lea.sflag [#allocation5], %s2157_s27 }
 0x4b5   : > { %3302 = dma.done.wait (!%p3062_p10), %s2158_s29, 2048  }
 0x4b6   : > { %3304 = vsyncadd (!%p3062_p10), %s2158_s29, 4294965248  ;;  %s23_s7 = sadd.s32 1, %s3347_s7   ;;  %s4738_s8 = sld [smem:[#allocation8_spill]] }
 0x4b7   : > { %p20_p3 = scmp.ge.s32.totalorder %s23_s7, 6   ;;  %s4739_s23 = sld [smem:[#allocation17_spill]] }
 0x4b8   : > { %s4740_s18 = sld [smem:[#allocation10_spill]]  ;;  %s4741_s26 = sld [smem:[#allocation16_spill]] }
 0x4b9   : > { %s4742_s27 = sld [smem:[#allocation11_spill]]  ;;  %s4743_s28 = sld [smem:[#allocation12_spill]] }
 0x4ba   : > { %s4744_s29 = sld [smem:[#allocation13_spill]]  ;;  %s4745_s30 = sld [smem:[#allocation15_spill]] }
 0x4bb   : > { %s4746_s21 = smov %s3311_s22  ;;  %s4748_s24 = smov %s3323_s25 }
 0x4bc   : > { %s4747_s22 = smov %s4738_s8  ;;  %22 = sbr.rel (!%p20_p3) target bundleno = 12 (0xc), region = 102 }
 0x4be   : > { %s4749_s25 = smov %s4740_s18 }
 0x4c3   :  { %2163 = vsyncpa [#allocation3], 1 }
 0x4c4   :  { %2165 = vsyncpa [#allocation3 + $0x1], 1 }
 0x4c5   :  { %2166 = vsyncpa [#allocation5], 1 }
 0x4c6   :  { %2168 = vsyncpa [#allocation5 + $0x1], 1 }

</bundles_post_ra>
